<compile_context>
chip_gen: v6e
topology: v6e:2x2x1
jax: 0.10.0
libtpu: 0.0.40
codegen_flags: <defaults>
</compile_context>

<pallas_src>
import functools

import jax
import jax.numpy as jnp
from jax.experimental import pallas as pl
from jax.experimental.pallas import tpu as pltpu


def _inverted_residual_kernel(x_ref, w1_ref, b1_ref, wdw_ref, b2_ref,
                              w3_ref, b3_ref, o_ref, pad_ref,
                              *, H, W, Cin, Chid, Cout, stride, expand,
                              use_shortcut, Ho, Wo, compute_dtype):
    """One batch element per grid step; expand -> depthwise -> project fused."""
    x = x_ref[0]                                        # (H*W, Cin) float32

    # ---- stage 1: 1x1 expand conv (BN scale pre-folded into w1) + ReLU6 ---
    if expand:
        h = jnp.dot(x.astype(compute_dtype), w1_ref[...],
                    preferred_element_type=jnp.float32)  # (H*W, Chid)
        h = jnp.clip(h + b1_ref[...], 0.0, 6.0)
    else:
        h = x                                            # Chid == Cin

    # ---- stage 2: 3x3 depthwise (pad=1, stride) + bias + ReLU6 ------------
    # Zero only the 1-px border (perimeter) each step; interior is fully
    # overwritten below.  No full-buffer zero, no full-buffer reload.
    zrow = jnp.zeros((1, W + 2, Chid), jnp.float32)
    zcol = jnp.zeros((H + 2, 1, Chid), jnp.float32)
    pad_ref[0:1, :, :] = zrow
    pad_ref[H + 1:H + 2, :, :] = zrow
    pad_ref[:, 0:1, :] = zcol
    pad_ref[:, W + 1:W + 2, :] = zcol
    pad_ref[1:H + 1, 1:W + 1, :] = h.reshape(H, W, Chid)

    wdw = wdw_ref[...]                                   # (9, Chid), scale folded
    acc = None
    if stride == 1:
        # Contiguous (unit-stride) tap windows read directly from the scratch.
        for ki in range(3):
            for kj in range(3):
                win = pad_ref[ki:ki + Ho, kj:kj + Wo, :]     # (Ho, Wo, Chid)
                contrib = win * wdw[ki * 3 + kj:ki * 3 + kj + 1, :]
                acc = contrib if acc is None else acc + contrib
    else:
        # Stride 2: one even/odd parity split (4 strided slices) then 9
        # contiguous slices, instead of 9 strided slices.
        padded = pad_ref[...]                             # (H+2, W+2, Chid)
        planes = {}
        for pi in range(2):
            for pj in range(2):
                planes[(pi, pj)] = jax.lax.slice(
                    padded, (pi, pj, 0), (H + 2, W + 2, Chid), (2, 2, 1))
        for ki in range(3):
            for kj in range(3):
                p = planes[(ki % 2, kj % 2)]
                oi, oj = ki // 2, kj // 2
                win = jax.lax.slice(p, (oi, oj, 0), (oi + Ho, oj + Wo, Chid))
                contrib = win * wdw[ki * 3 + kj:ki * 3 + kj + 1, :]
                acc = contrib if acc is None else acc + contrib

    h2 = jnp.clip(acc + b2_ref[...], 0.0, 6.0)            # (Ho, Wo, Chid)

    # ---- stage 3: 1x1 projection (BN scale pre-folded into w3), no act ----
    out = jnp.dot(h2.reshape(Ho * Wo, Chid).astype(compute_dtype), w3_ref[...],
                  preferred_element_type=jnp.float32)      # (Ho*Wo, Cout)
    out = out + b3_ref[...]
    if use_shortcut:
        out = out + x                                      # f32 residual
    o_ref[0] = out.astype(o_ref.dtype)


def inverted_residual(x_nchw, params, *, stride, expand_ratio,
                      compute_dtype=jnp.float32):
    """Pallas forward.  x_nchw: (N, Cin, H, W) f32 -> (N, Cout, Ho, Wo) f32."""
    N, Cin, H, W = x_nchw.shape
    Chid = Cin * expand_ratio
    Cout = params["w3"].shape[1]
    expand = expand_ratio != 1
    use_shortcut = (stride == 1) and (Cin == Cout)
    Ho = (H + 2 - 3) // stride + 1
    Wo = (W + 2 - 3) // stride + 1

    # NCHW -> NHWC -> (N, H*W, C): channels on the lane axis, flattened
    # spatial feeds the MXU M dimension without in-kernel minor-dim reshapes.
    x = jnp.transpose(x_nchw, (0, 2, 3, 1)).astype(jnp.float32)
    x = x.reshape(N, H * W, Cin)

    # Fold eval-mode BN scale into the conv weights host-side (kernel adds
    # only the bias).  Matmul weights may be cast to bf16 (compute_dtype).
    w1 = (params["w1"] * params["scale1"]).astype(compute_dtype)   # (Cin, Chid)
    wdw = (params["wdw"] * params["scale2"]).astype(jnp.float32)   # (9, Chid)
    w3 = (params["w3"] * params["scale3"]).astype(compute_dtype)   # (Chid, Cout)
    b1 = params["bias1"].astype(jnp.float32)                       # (1, Chid)
    b2 = params["bias2"].astype(jnp.float32)                       # (1, Chid)
    b3 = params["bias3"].astype(jnp.float32)                       # (1, Cout)

    kernel = functools.partial(
        _inverted_residual_kernel,
        H=H, W=W, Cin=Cin, Chid=Chid, Cout=Cout,
        stride=stride, expand=expand, use_shortcut=use_shortcut,
        Ho=Ho, Wo=Wo, compute_dtype=compute_dtype)

    out_flat = pl.pallas_call(
        kernel,
        out_shape=jax.ShapeDtypeStruct((N, Ho * Wo, Cout), jnp.float32),
        grid_spec=pltpu.PrefetchScalarGridSpec(
            num_scalar_prefetch=0,
            grid=(N,),
            in_specs=[
                pl.BlockSpec((1, H * W, Cin), lambda n: (n, 0, 0)),
                pl.BlockSpec((Cin, Chid),     lambda n: (0, 0)),
                pl.BlockSpec((1, Chid),       lambda n: (0, 0)),
                pl.BlockSpec((9, Chid),       lambda n: (0, 0)),
                pl.BlockSpec((1, Chid),       lambda n: (0, 0)),
                pl.BlockSpec((Chid, Cout),    lambda n: (0, 0)),
                pl.BlockSpec((1, Cout),       lambda n: (0, 0)),
            ],
            out_specs=pl.BlockSpec((1, Ho * Wo, Cout), lambda n: (n, 0, 0)),
            scratch_shapes=[pltpu.VMEM((H + 2, W + 2, Chid), jnp.float32)],
        ),
        compiler_params=pltpu.CompilerParams(
            dimension_semantics=("parallel",)),
    )(x, w1, b1, wdw, b2, w3, b3)

    out = out_flat.reshape(N, Ho, Wo, Cout)
    return jnp.transpose(out, (0, 3, 1, 2))               # back to NCHW


# ---------------------------------------------------------------------------
# deterministic parameter construction (BN folded to scale/bias, eps=1e-5)
# ---------------------------------------------------------------------------
def init_params(key, Cin, Cout, expand_ratio):
    Chid = Cin * expand_ratio
    eps = 1e-5
    ks = jax.random.split(key, 15)

    def folded_bn(kg, kb, km, kv, C):
        gamma = jax.random.uniform(kg, (C,), jnp.float32, 0.5, 1.5)
        beta = jax.random.normal(kb, (C,), jnp.float32) * 0.1
        mean = jax.random.normal(km, (C,), jnp.float32) * 0.1
        var = jax.random.uniform(kv, (C,), jnp.float32, 0.5, 1.5)
        scale = gamma / jnp.sqrt(var + eps)
        bias = beta - mean * scale
        return scale.reshape(1, C), bias.reshape(1, C)

    w1 = jax.random.normal(ks[0], (Cin, Chid), jnp.float32) * 0.1
    scale1, bias1 = folded_bn(ks[1], ks[2], ks[3], ks[4], Chid)

    wdw = jax.random.normal(ks[5], (9, Chid), jnp.float32) * 0.1
    scale2, bias2 = folded_bn(ks[6], ks[7], ks[8], ks[9], Chid)

    w3 = jax.random.normal(ks[10], (Chid, Cout), jnp.float32) * 0.1
    scale3, bias3 = folded_bn(ks[11], ks[12], ks[13], ks[14], Cout)

    return dict(w1=w1, scale1=scale1, bias1=bias1,
                wdw=wdw, scale2=scale2, bias2=bias2,
                w3=w3, scale3=scale3, bias3=bias3)


# ---------------------------------------------------------------------------
# pure-JAX reference (f32, un-fused) for correctness check
# ---------------------------------------------------------------------------
def reference(x_nchw, params, *, stride, expand_ratio):
    x = jnp.transpose(x_nchw, (0, 2, 3, 1)).astype(jnp.float32)
    N, H, W, Cin = x.shape
    Chid = Cin * expand_ratio
    Cout = params["w3"].shape[1]
    Ho = (H + 2 - 3) // stride + 1
    Wo = (W + 2 - 3) // stride + 1

    if expand_ratio != 1:
        h = jnp.einsum("nhwc,cd->nhwd", x, params["w1"])
        h = jnp.clip(h * params["scale1"][0] + params["bias1"][0], 0.0, 6.0)
    else:
        h = x

    pad = jnp.pad(h, ((0, 0), (1, 1), (1, 1), (0, 0)))
    wdw = params["wdw"].reshape(3, 3, Chid)
    acc = jnp.zeros((N, Ho, Wo, Chid), jnp.float32)
    for ki in range(3):
        for kj in range(3):
            acc = acc + pad[:,
                            ki:ki + (Ho - 1) * stride + 1:stride,
                            kj:kj + (Wo - 1) * stride + 1:stride,
                            :] * wdw[ki, kj]
    h2 = jnp.clip(acc * params["scale2"][0] + params["bias2"][0], 0.0, 6.0)

    out = jnp.einsum("nhwc,cd->nhwd", h2, params["w3"])
    out = out * params["scale3"][0] + params["bias3"][0]
    if stride == 1 and Cin == Cout:
        out = out + x
    return jnp.transpose(out, (0, 3, 1, 2))


if __name__ == "__main__":
    key = jax.random.PRNGKey(0)
    kx, kpA, kpB = jax.random.split(key, 3)

    N, Cin, H, W = 2, 4, 16, 16
    x = jax.random.normal(kx, (N, Cin, H, W), jnp.float32)

    # Config A: expand_ratio=2, stride=1, Cin==Cout -> shortcut path (strict f32)
    pA = init_params(kpA, Cin, 4, 2)
    outA = jax.block_until_ready(
        inverted_residual(x, pA, stride=1, expand_ratio=2))
    refA = reference(x, pA, stride=1, expand_ratio=2)
    assert outA.shape == refA.shape, (outA.shape, refA.shape)
    assert jnp.allclose(outA, refA, atol=1e-4, rtol=1e-4), float(
        jnp.max(jnp.abs(outA - refA)))

    # Config B: expand_ratio=1 (no expand conv), Cout=8 -> no shortcut (strict f32)
    pB = init_params(kpB, Cin, 8, 1)
    outB = jax.block_until_ready(
        inverted_residual(x, pB, stride=1, expand_ratio=1))
    refB = reference(x, pB, stride=1, expand_ratio=1)
    assert outB.shape == refB.shape, (outB.shape, refB.shape)
    assert jnp.allclose(outB, refB, atol=1e-4, rtol=1e-4), float(
        jnp.max(jnp.abs(outB - refB)))

    # Config C: bf16 matmul operands (MXU-native dtype), loose tolerance vs f32 ref.
    outC = jax.block_until_ready(
        inverted_residual(x, pA, stride=1, expand_ratio=2,
                          compute_dtype=jnp.bfloat16))
    assert jnp.allclose(outC, refA, atol=5e-2, rtol=5e-2), float(
        jnp.max(jnp.abs(outC - refA)))

    print("KERNEL_OK")
</pallas_src>

<mosaic_0001>
module attributes {stable_mosaic.version = 11 : i64} {
  func.func @_inverted_residual_kernel(%arg0: i32, %arg1: memref<1x256x4xf32, #tpu.memory_space<vmem>>, %arg2: memref<4x8xf32, #tpu.memory_space<vmem>>, %arg3: memref<1x8xf32, #tpu.memory_space<vmem>>, %arg4: memref<9x8xf32, #tpu.memory_space<vmem>>, %arg5: memref<1x8xf32, #tpu.memory_space<vmem>>, %arg6: memref<8x4xf32, #tpu.memory_space<vmem>>, %arg7: memref<1x4xf32, #tpu.memory_space<vmem>>, %arg8: memref<1x256x4xf32, #tpu.memory_space<vmem>>, %arg9: memref<18x18x8xf32, #tpu.memory_space<vmem>>) attributes {dimension_semantics = [#tpu.dimension_semantics<parallel>], iteration_bounds = array<i64: 2>, scalar_prefetch = 0 : i64, scratch_operands = 1 : i64, tpu.core_type = #tpu.core_type<tc>, window_params = [{transform_indices = @transform_0, window_bounds = array<i64: 1, 256, 4>}, {pipeline_mode = #tpu.pipeline_mode<synchronous>, transform_indices = @transform_1, window_bounds = array<i64: 4, 8>}, {pipeline_mode = #tpu.pipeline_mode<synchronous>, transform_indices = @transform_2, window_bounds = array<i64: 1, 8>}, {pipeline_mode = #tpu.pipeline_mode<synchronous>, transform_indices = @transform_3, window_bounds = array<i64: 9, 8>}, {pipeline_mode = #tpu.pipeline_mode<synchronous>, transform_indices = @transform_4, window_bounds = array<i64: 1, 8>}, {pipeline_mode = #tpu.pipeline_mode<synchronous>, transform_indices = @transform_5, window_bounds = array<i64: 8, 4>}, {pipeline_mode = #tpu.pipeline_mode<synchronous>, transform_indices = @transform_6, window_bounds = array<i64: 1, 4>}, {transform_indices = @transform_7, window_bounds = array<i64: 1, 256, 4>}]} {
    %c0 = arith.constant 0 : index
    %c0_0 = arith.constant 0 : index
    %c0_1 = arith.constant 0 : index
    %0 = vector.load %arg1[%c0, %c0_0, %c0_1] : memref<1x256x4xf32, #tpu.memory_space<vmem>>, vector<1x256x4xf32>
    %1 = vector.shape_cast %0 : vector<1x256x4xf32> to vector<256x4xf32>
    %c0_2 = arith.constant 0 : index
    %c0_3 = arith.constant 0 : index
    %2 = vector.load %arg2[%c0_2, %c0_3] : memref<4x8xf32, #tpu.memory_space<vmem>>, vector<4x8xf32>
    %cst = arith.constant dense<0.000000e+00> : vector<256x8xf32>
    %3 = tpu.matmul %1, %2, %cst {dimension_numbers = #tpu.dot_dimension_numbers<[1], [0], [0], [1], [0, 0, 1, 1], [], []>} : vector<256x4xf32>, vector<4x8xf32>, vector<256x8xf32> -> vector<256x8xf32>
    %c0_4 = arith.constant 0 : index
    %c0_5 = arith.constant 0 : index
    %4 = vector.load %arg3[%c0_4, %c0_5] : memref<1x8xf32, #tpu.memory_space<vmem>>, vector<1x8xf32>
    %5 = vector.broadcast %4 : vector<1x8xf32> to vector<256x8xf32>
    %6 = arith.addf %3, %5 : vector<256x8xf32>
    %cst_6 = arith.constant 0.000000e+00 : f32
    %cst_7 = arith.constant 6.000000e+00 : f32
    %7 = vector.broadcast %cst_6 : f32 to vector<256x8xf32>
    %8 = arith.maximumf %7, %6 : vector<256x8xf32>
    %9 = vector.broadcast %cst_7 : f32 to vector<256x8xf32>
    %10 = arith.minimumf %9, %8 : vector<256x8xf32>
    %cst_8 = arith.constant 0.000000e+00 : f32
    %11 = vector.broadcast %cst_8 : f32 to vector<1x18x8xf32>
    %cst_9 = arith.constant 0.000000e+00 : f32
    %12 = vector.broadcast %cst_9 : f32 to vector<18x1x8xf32>
    %c0_10 = arith.constant 0 : index
    %c0_11 = arith.constant 0 : index
    %c0_12 = arith.constant 0 : index
    %13 = vector.load %arg9[%c0_10, %c0_11, %c0_12] : memref<18x18x8xf32, #tpu.memory_space<vmem>>, vector<1x18x8xf32>
    tpu.vector_store %arg9[%c0_10, %c0_11, %c0_12], %11 {strides = array<i32>} : memref<18x18x8xf32, #tpu.memory_space<vmem>>, vector<1x18x8xf32>,
    %c17 = arith.constant 17 : index
    %c0_13 = arith.constant 0 : index
    %c0_14 = arith.constant 0 : index
    %14 = vector.load %arg9[%c17, %c0_13, %c0_14] : memref<18x18x8xf32, #tpu.memory_space<vmem>>, vector<1x18x8xf32>
    tpu.vector_store %arg9[%c17, %c0_13, %c0_14], %11 {strides = array<i32>} : memref<18x18x8xf32, #tpu.memory_space<vmem>>, vector<1x18x8xf32>,
    %c0_15 = arith.constant 0 : index
    %c0_16 = arith.constant 0 : index
    %c0_17 = arith.constant 0 : index
    %15 = vector.load %arg9[%c0_15, %c0_16, %c0_17] : memref<18x18x8xf32, #tpu.memory_space<vmem>>, vector<18x1x8xf32>
    tpu.vector_store %arg9[%c0_15, %c0_16, %c0_17], %12 {strides = array<i32>} : memref<18x18x8xf32, #tpu.memory_space<vmem>>, vector<18x1x8xf32>,
    %c0_18 = arith.constant 0 : index
    %c17_19 = arith.constant 17 : index
    %c0_20 = arith.constant 0 : index
    %16 = vector.load %arg9[%c0_18, %c17_19, %c0_20] : memref<18x18x8xf32, #tpu.memory_space<vmem>>, vector<18x1x8xf32>
    tpu.vector_store %arg9[%c0_18, %c17_19, %c0_20], %12 {strides = array<i32>} : memref<18x18x8xf32, #tpu.memory_space<vmem>>, vector<18x1x8xf32>,
    %17 = vector.shape_cast %10 : vector<256x8xf32> to vector<16x16x8xf32>
    %c1 = arith.constant 1 : index
    %c1_21 = arith.constant 1 : index
    %c0_22 = arith.constant 0 : index
    %18 = vector.load %arg9[%c1, %c1_21, %c0_22] : memref<18x18x8xf32, #tpu.memory_space<vmem>>, vector<16x16x8xf32>
    tpu.vector_store %arg9[%c1, %c1_21, %c0_22], %17 {strides = array<i32>} : memref<18x18x8xf32, #tpu.memory_space<vmem>>, vector<16x16x8xf32>,
    %c0_23 = arith.constant 0 : index
    %c0_24 = arith.constant 0 : index
    %19 = vector.load %arg4[%c0_23, %c0_24] : memref<9x8xf32, #tpu.memory_space<vmem>>, vector<9x8xf32>
    %c0_25 = arith.constant 0 : index
    %c0_26 = arith.constant 0 : index
    %c0_27 = arith.constant 0 : index
    %20 = vector.load %arg9[%c0_25, %c0_26, %c0_27] : memref<18x18x8xf32, #tpu.memory_space<vmem>>, vector<16x16x8xf32>
    %21 = vector.extract_strided_slice %19 {offsets = [0, 0], sizes = [1, 8], strides = [1, 1]} : vector<9x8xf32> to vector<1x8xf32>
    %22 = vector.shape_cast %21 : vector<1x8xf32> to vector<1x1x8xf32>
    %23 = vector.broadcast %22 : vector<1x1x8xf32> to vector<16x16x8xf32>
    %24 = arith.mulf %20, %23 : vector<16x16x8xf32>
    %c0_28 = arith.constant 0 : index
    %c1_29 = arith.constant 1 : index
    %c0_30 = arith.constant 0 : index
    %25 = vector.load %arg9[%c0_28, %c1_29, %c0_30] : memref<18x18x8xf32, #tpu.memory_space<vmem>>, vector<16x16x8xf32>
    %26 = vector.extract_strided_slice %19 {offsets = [1, 0], sizes = [1, 8], strides = [1, 1]} : vector<9x8xf32> to vector<1x8xf32>
    %27 = vector.shape_cast %26 : vector<1x8xf32> to vector<1x1x8xf32>
    %28 = vector.broadcast %27 : vector<1x1x8xf32> to vector<16x16x8xf32>
    %29 = arith.mulf %25, %28 : vector<16x16x8xf32>
    %30 = arith.addf %24, %29 : vector<16x16x8xf32>
    %c0_31 = arith.constant 0 : index
    %c2 = arith.constant 2 : index
    %c0_32 = arith.constant 0 : index
    %31 = vector.load %arg9[%c0_31, %c2, %c0_32] : memref<18x18x8xf32, #tpu.memory_space<vmem>>, vector<16x16x8xf32>
    %32 = vector.extract_strided_slice %19 {offsets = [2, 0], sizes = [1, 8], strides = [1, 1]} : vector<9x8xf32> to vector<1x8xf32>
    %33 = vector.shape_cast %32 : vector<1x8xf32> to vector<1x1x8xf32>
    %34 = vector.broadcast %33 : vector<1x1x8xf32> to vector<16x16x8xf32>
    %35 = arith.mulf %31, %34 : vector<16x16x8xf32>
    %36 = arith.addf %30, %35 : vector<16x16x8xf32>
    %c1_33 = arith.constant 1 : index
    %c0_34 = arith.constant 0 : index
    %c0_35 = arith.constant 0 : index
    %37 = vector.load %arg9[%c1_33, %c0_34, %c0_35] : memref<18x18x8xf32, #tpu.memory_space<vmem>>, vector<16x16x8xf32>
    %38 = vector.extract_strided_slice %19 {offsets = [3, 0], sizes = [1, 8], strides = [1, 1]} : vector<9x8xf32> to vector<1x8xf32>
    %39 = vector.shape_cast %38 : vector<1x8xf32> to vector<1x1x8xf32>
    %40 = vector.broadcast %39 : vector<1x1x8xf32> to vector<16x16x8xf32>
    %41 = arith.mulf %37, %40 : vector<16x16x8xf32>
    %42 = arith.addf %36, %41 : vector<16x16x8xf32>
    %c1_36 = arith.constant 1 : index
    %c1_37 = arith.constant 1 : index
    %c0_38 = arith.constant 0 : index
    %43 = vector.load %arg9[%c1_36, %c1_37, %c0_38] : memref<18x18x8xf32, #tpu.memory_space<vmem>>, vector<16x16x8xf32>
    %44 = vector.extract_strided_slice %19 {offsets = [4, 0], sizes = [1, 8], strides = [1, 1]} : vector<9x8xf32> to vector<1x8xf32>
    %45 = vector.shape_cast %44 : vector<1x8xf32> to vector<1x1x8xf32>
    %46 = vector.broadcast %45 : vector<1x1x8xf32> to vector<16x16x8xf32>
    %47 = arith.mulf %43, %46 : vector<16x16x8xf32>
    %48 = arith.addf %42, %47 : vector<16x16x8xf32>
    %c1_39 = arith.constant 1 : index
    %c2_40 = arith.constant 2 : index
    %c0_41 = arith.constant 0 : index
    %49 = vector.load %arg9[%c1_39, %c2_40, %c0_41] : memref<18x18x8xf32, #tpu.memory_space<vmem>>, vector<16x16x8xf32>
    %50 = vector.extract_strided_slice %19 {offsets = [5, 0], sizes = [1, 8], strides = [1, 1]} : vector<9x8xf32> to vector<1x8xf32>
    %51 = vector.shape_cast %50 : vector<1x8xf32> to vector<1x1x8xf32>
    %52 = vector.broadcast %51 : vector<1x1x8xf32> to vector<16x16x8xf32>
    %53 = arith.mulf %49, %52 : vector<16x16x8xf32>
    %54 = arith.addf %48, %53 : vector<16x16x8xf32>
    %c2_42 = arith.constant 2 : index
    %c0_43 = arith.constant 0 : index
    %c0_44 = arith.constant 0 : index
    %55 = vector.load %arg9[%c2_42, %c0_43, %c0_44] : memref<18x18x8xf32, #tpu.memory_space<vmem>>, vector<16x16x8xf32>
    %56 = vector.extract_strided_slice %19 {offsets = [6, 0], sizes = [1, 8], strides = [1, 1]} : vector<9x8xf32> to vector<1x8xf32>
    %57 = vector.shape_cast %56 : vector<1x8xf32> to vector<1x1x8xf32>
    %58 = vector.broadcast %57 : vector<1x1x8xf32> to vector<16x16x8xf32>
    %59 = arith.mulf %55, %58 : vector<16x16x8xf32>
    %60 = arith.addf %54, %59 : vector<16x16x8xf32>
    %c2_45 = arith.constant 2 : index
    %c1_46 = arith.constant 1 : index
    %c0_47 = arith.constant 0 : index
    %61 = vector.load %arg9[%c2_45, %c1_46, %c0_47] : memref<18x18x8xf32, #tpu.memory_space<vmem>>, vector<16x16x8xf32>
    %62 = vector.extract_strided_slice %19 {offsets = [7, 0], sizes = [1, 8], strides = [1, 1]} : vector<9x8xf32> to vector<1x8xf32>
    %63 = vector.shape_cast %62 : vector<1x8xf32> to vector<1x1x8xf32>
    %64 = vector.broadcast %63 : vector<1x1x8xf32> to vector<16x16x8xf32>
    %65 = arith.mulf %61, %64 : vector<16x16x8xf32>
    %66 = arith.addf %60, %65 : vector<16x16x8xf32>
    %c2_48 = arith.constant 2 : index
    %c2_49 = arith.constant 2 : index
    %c0_50 = arith.constant 0 : index
    %67 = vector.load %arg9[%c2_48, %c2_49, %c0_50] : memref<18x18x8xf32, #tpu.memory_space<vmem>>, vector<16x16x8xf32>
    %68 = vector.extract_strided_slice %19 {offsets = [8, 0], sizes = [1, 8], strides = [1, 1]} : vector<9x8xf32> to vector<1x8xf32>
    %69 = vector.shape_cast %68 : vector<1x8xf32> to vector<1x1x8xf32>
    %70 = vector.broadcast %69 : vector<1x1x8xf32> to vector<16x16x8xf32>
    %71 = arith.mulf %67, %70 : vector<16x16x8xf32>
    %72 = arith.addf %66, %71 : vector<16x16x8xf32>
    %c0_51 = arith.constant 0 : index
    %c0_52 = arith.constant 0 : index
    %73 = vector.load %arg5[%c0_51, %c0_52] : memref<1x8xf32, #tpu.memory_space<vmem>>, vector<1x8xf32>
    %74 = vector.shape_cast %73 : vector<1x8xf32> to vector<1x1x8xf32>
    %75 = vector.broadcast %74 : vector<1x1x8xf32> to vector<16x16x8xf32>
    %76 = arith.addf %72, %75 : vector<16x16x8xf32>
    %cst_53 = arith.constant 0.000000e+00 : f32
    %cst_54 = arith.constant 6.000000e+00 : f32
    %77 = vector.broadcast %cst_53 : f32 to vector<16x16x8xf32>
    %78 = arith.maximumf %77, %76 : vector<16x16x8xf32>
    %79 = vector.broadcast %cst_54 : f32 to vector<16x16x8xf32>
    %80 = arith.minimumf %79, %78 : vector<16x16x8xf32>
    %81 = vector.shape_cast %80 : vector<16x16x8xf32> to vector<256x8xf32>
    %c0_55 = arith.constant 0 : index
    %c0_56 = arith.constant 0 : index
    %82 = vector.load %arg6[%c0_55, %c0_56] : memref<8x4xf32, #tpu.memory_space<vmem>>, vector<8x4xf32>
    %cst_57 = arith.constant dense<0.000000e+00> : vector<256x4xf32>
    %83 = tpu.matmul %81, %82, %cst_57 {dimension_numbers = #tpu.dot_dimension_numbers<[1], [0], [0], [1], [0, 0, 1, 1], [], []>} : vector<256x8xf32>, vector<8x4xf32>, vector<256x4xf32> -> vector<256x4xf32>
    %c0_58 = arith.constant 0 : index
    %c0_59 = arith.constant 0 : index
    %84 = vector.load %arg7[%c0_58, %c0_59] : memref<1x4xf32, #tpu.memory_space<vmem>>, vector<1x4xf32>
    %85 = vector.broadcast %84 : vector<1x4xf32> to vector<256x4xf32>
    %86 = arith.addf %83, %85 : vector<256x4xf32>
    %87 = arith.addf %86, %1 : vector<256x4xf32>
    %c0_60 = arith.constant 0 : index
    %c0_61 = arith.constant 0 : index
    %c0_62 = arith.constant 0 : index
    %88 = vector.load %arg8[%c0_60, %c0_61, %c0_62] : memref<1x256x4xf32, #tpu.memory_space<vmem>>, vector<1x256x4xf32>
    %89 = vector.shape_cast %88 : vector<1x256x4xf32> to vector<256x4xf32>
    %90 = vector.shape_cast %87 : vector<256x4xf32> to vector<1x256x4xf32>
    tpu.vector_store %arg8[%c0_60, %c0_61, %c0_62], %90 {strides = array<i32>} : memref<1x256x4xf32, #tpu.memory_space<vmem>>, vector<1x256x4xf32>,
    return
  }
  func.func @transform_0(%arg0: i32) -> (i32, i32, i32) {
    %c0_i32 = arith.constant 0 : i32
    %c0_i32_0 = arith.constant 0 : i32
    %c0_i32_1 = arith.constant 0 : i32
    return %arg0, %c0_i32, %c0_i32_0 : i32, i32, i32
  }
  func.func @transform_1(%arg0: i32) -> (i32, i32) {
    %c0_i32 = arith.constant 0 : i32
    %c0_i32_0 = arith.constant 0 : i32
    %c0_i32_1 = arith.constant 0 : i32
    return %c0_i32, %c0_i32_0 : i32, i32
  }
  func.func @transform_2(%arg0: i32) -> (i32, i32) {
    %c0_i32 = arith.constant 0 : i32
    %c0_i32_0 = arith.constant 0 : i32
    %c0_i32_1 = arith.constant 0 : i32
    return %c0_i32, %c0_i32_0 : i32, i32
  }
  func.func @transform_3(%arg0: i32) -> (i32, i32) {
    %c0_i32 = arith.constant 0 : i32
    %c0_i32_0 = arith.constant 0 : i32
    %c0_i32_1 = arith.constant 0 : i32
    return %c0_i32, %c0_i32_0 : i32, i32
  }
  func.func @transform_4(%arg0: i32) -> (i32, i32) {
    %c0_i32 = arith.constant 0 : i32
    %c0_i32_0 = arith.constant 0 : i32
    %c0_i32_1 = arith.constant 0 : i32
    return %c0_i32, %c0_i32_0 : i32, i32
  }
  func.func @transform_5(%arg0: i32) -> (i32, i32) {
    %c0_i32 = arith.constant 0 : i32
    %c0_i32_0 = arith.constant 0 : i32
    %c0_i32_1 = arith.constant 0 : i32
    return %c0_i32, %c0_i32_0 : i32, i32
  }
  func.func @transform_6(%arg0: i32) -> (i32, i32) {
    %c0_i32 = arith.constant 0 : i32
    %c0_i32_0 = arith.constant 0 : i32
    %c0_i32_1 = arith.constant 0 : i32
    return %c0_i32, %c0_i32_0 : i32, i32
  }
  func.func @transform_7(%arg0: i32) -> (i32, i32, i32) {
    %c0_i32 = arith.constant 0 : i32
    %c0_i32_0 = arith.constant 0 : i32
    %c0_i32_1 = arith.constant 0 : i32
    return %arg0, %c0_i32, %c0_i32_0 : i32, i32, i32
  }
}

</mosaic_0001>

<bundles_post_ra>
// kernel: tpu_custom_call.1
= control target key start
LH: loop header
LB: loop body
LE: loop exit
PB: predicated region body
PF: predicated region fallthrough
CT: control target
= control target key end

     0   :  { %s2550_s24 = smov 0   ;;  %s3666_s0 = inlined_call_operand.vmem [shape: f32[2,256,4], index: 0, kind: input, shape index: {}]   ;;  %s3667_s1 = inlined_call_operand.vmem [shape: f32[4,8], index: 1, kind: input, shape index: {}]   ;;  %s3668_s2 = inlined_call_operand.vmem [shape: f32[1,8], index: 2, kind: input, shape index: {}]   ;;  %s3669_s3 = inlined_call_operand.vmem [shape: f32[9,8], index: 3, kind: input, shape index: {}]   ;;  %s3670_s4 = inlined_call_operand.vmem [shape: f32[1,8], index: 4, kind: input, shape index: {}]   ;;  %s3671_s5 = inlined_call_operand.vmem [shape: f32[8,4], index: 5, kind: input, shape index: {}]   ;;  %s3672_s6 = inlined_call_operand.vmem [shape: f32[1,4], index: 6, kind: input, shape index: {}]   ;;  %s3673_s7 = inlined_call_operand.vmem [shape: f32[2,256,4], index: 7, kind: output, shape index: {}]  }
   0x1 LB: > { %s2210_s25 = sadd.s32 4294967295, %s2507_s24   ;;  %p2214_p0 = scmp.ge.s32.totalorder %s2507_s24, 1  ;;  %s2507_s24 = sphi %s2550_s24, %s17_s24  }
   0x2   : > { %p237_p1 = scmp.lt.s32.totalorder %s2507_s24, 3 }
   0x4   : > { %p238_p2 = pnand %p2214_p0, %p237_p1 }
   0x5   : > { %p269_p3 = scmp.lt.s32.totalorder (!%p238_p2), %s2210_s25, 1 }
   0x6   : > { %241 = sbr.rel (%p238_p2) target bundleno = 612 (0x264), region = 48 }
   0xb   : > { %v311_v0 = vld [vmem:[%s3667_s1] sm:$0xf]  ;;  %vm416_vm0 = vcmask 1043456   ;;  %s3675_s25 = smov (!%p269_p3, %s2210_s25), 1  ;;  %vm319_vm1 = vcmask 31744   ;;  %vm709_vm2 = vcmask 64512   ;;  %v822_v35 = vlaneseq }
   0xc   : > { %2358 = vmatprep.subr.msk.mxu0 %vm416_vm0, %v311_v0  ;;  %s2290_s28 = sshll.u32 %s3675_s25, 8  ;;  %v2509_v33 = vmov 0.0   ;;  %vm718_vm3 = vcmask 57344   ;;  %vm712_vm4 = vcmask 58368   ;;  %v1762_v34 = vld [vmem:[%s3671_s5] sm:$0xff] }
   0xd   : > { %2359 = vmatpush3.msk.msra.mxu0 %vm416_vm0, %v311_v0  ;;  %s2569_s8 = scalar_lea.vmem %s3666_s0, %s2290_s28  ;;  %710 = vst.msk [vmem:[#allocation2] sm:$0xff] %vm709_vm2, %v2509_v33  ;;  %711 = vst.msk [vmem:[#allocation2 + $0x8] sm:$0xff] %vm709_vm2, %v2509_v33  ;;  %2408 = vmatprep.subr.mxu1 %v1762_v34  ;;  %v2678_v36 = vshrl.u32 %v822_v35, 7  ;;  %v2683_v37 = vld [vmem:[%s3668_s2] ss:$0 sm:$0xff]  ;;  %s3534_s30 = scalar_lea.vmem %s3673_s7, %s2290_s28 }
   0xe   : > { %v279_v1 = vld [vmem:[%s2569_s8] sm:$0xff]  ;;  %v280_v2 = vld [vmem:[%s2569_s8 + $0x8] sm:$0xff]  ;;  %v281_v3 = vld [vmem:[%s2569_s8 + $0x10] sm:$0xff]  ;;  %715 = vst.msk [vmem:[#allocation2 + $0x198] sm:$0xff] %vm709_vm2, %v2509_v33  ;;  %2409 = vmatpush3.msra.mxu1 %v1762_v34 }
   0xf   : > { %2360 = vmatprep.mubr.msk.f32.mxu0 %vm319_vm1, %v279_v1  ;;  %v282_v4 = vld [vmem:[%s2569_s8 + $0x18] sm:$0xff]  ;;  %v283_v5 = vld [vmem:[%s2569_s8 + $0x20] sm:$0xff]  ;;  %v284_v6 = vld [vmem:[%s2569_s8 + $0x28] sm:$0xff]  ;;  %716 = vst.msk [vmem:[#allocation2 + $0x1a0] sm:$0xff] %vm709_vm2, %v2509_v33  ;;  %v824_v38 = vsub.s32 0, %v2678_v36  ;;  %v892_v39 = vsub.s32 1, %v2678_v36 }
  0x10   : > { %2361 = vmatmul.mubr.msk.f32.vlgmr.msra.gmra.mxu0 %vm319_vm1, %v280_v2  ;;  %v285_v7 = vld [vmem:[%s2569_s8 + $0x30] sm:$0xff]  ;;  %v286_v8 = vld [vmem:[%s2569_s8 + $0x38] sm:$0xff]  ;;  %v287_v9 = vld [vmem:[%s2569_s8 + $0x40] sm:$0xff]  ;;  %719 = vst.msk [vmem:[#allocation2] sm:$0x1] %vm718_vm3, %v2509_v33  ;;  %v992_v46 = vsub.s32 2, %v2678_v36 }
  0x11   : > { %2363 = vmatprep.mubr.msk.f32.mxu0 %vm319_vm1, %v281_v3  ;;  %v288_v10 = vld [vmem:[%s2569_s8 + $0x48] sm:$0xff]  ;;  %v289_v11 = vld [vmem:[%s2569_s8 + $0x50] sm:$0xff]  ;;  %v290_v12 = vld [vmem:[%s2569_s8 + $0x58] sm:$0xff]  ;;  %720 = vst.msk [vmem:[#allocation2 + $0x18] sm:$0x1] %vm718_vm3, %v2509_v33  ;;  %v1192_v61 = vsub.s32 4, %v2678_v36 }
  0x12   : > { %v291_v13 = vld [vmem:[%s2569_s8 + $0x60] sm:$0xff]  ;;  %v292_v14 = vld [vmem:[%s2569_s8 + $0x68] sm:$0xff]  ;;  %v293_v15 = vld [vmem:[%s2569_s8 + $0x70] sm:$0xff]  ;;  %721 = vst.msk [vmem:[#allocation2 + $0x30] sm:$0x1] %vm718_vm3, %v2509_v33  ;;  %v1292_v3 = vsub.s32 5, %v2678_v36 }
  0x13   : > { %v294_v16 = vld [vmem:[%s2569_s8 + $0x78] sm:$0xff]  ;;  %v295_v17 = vld [vmem:[%s2569_s8 + $0x80] sm:$0xff]  ;;  %v296_v18 = vld [vmem:[%s2569_s8 + $0x88] sm:$0xff]  ;;  %722 = vst.msk [vmem:[#allocation2 + $0x48] sm:$0x1] %vm718_vm3, %v2509_v33 }
  0x14   : > { %2364 = vmatmul.mubr.msk.f32.gmra.mxu0 %vm319_vm1, %v282_v4  ;;  %v297_v19 = vld [vmem:[%s2569_s8 + $0x90] sm:$0xff]  ;;  %v298_v20 = vld [vmem:[%s2569_s8 + $0x98] sm:$0xff]  ;;  %v299_v21 = vld [vmem:[%s2569_s8 + $0xa0] sm:$0xff]  ;;  %723 = vst.msk [vmem:[#allocation2 + $0x60] sm:$0x1] %vm718_vm3, %v2509_v33 }
  0x15   : > { %2366 = vmatprep.mubr.msk.f32.mxu0 %vm319_vm1, %v283_v5  ;;  %v300_v22 = vld [vmem:[%s2569_s8 + $0xa8] sm:$0xff]  ;;  %v301_v23 = vld [vmem:[%s2569_s8 + $0xb0] sm:$0xff]  ;;  %v302_v24 = vld [vmem:[%s2569_s8 + $0xb8] sm:$0xff]  ;;  %724 = vst.msk [vmem:[#allocation2 + $0x78] sm:$0x1] %vm718_vm3, %v2509_v33 }
  0x16   : > { %v303_v25 = vld [vmem:[%s2569_s8 + $0xc0] sm:$0xff]  ;;  %v304_v26 = vld [vmem:[%s2569_s8 + $0xc8] sm:$0xff]  ;;  %v305_v27 = vld [vmem:[%s2569_s8 + $0xd0] sm:$0xff]  ;;  %725 = vst.msk [vmem:[#allocation2 + $0x90] sm:$0x1] %vm718_vm3, %v2509_v33 }
  0x17   : > { %v306_v28 = vld [vmem:[%s2569_s8 + $0xd8] sm:$0xff]  ;;  %v307_v29 = vld [vmem:[%s2569_s8 + $0xe0] sm:$0xff]  ;;  %v308_v30 = vld [vmem:[%s2569_s8 + $0xe8] sm:$0xff]  ;;  %726 = vst.msk [vmem:[#allocation2 + $0xa8] sm:$0x1] %vm718_vm3, %v2509_v33 }
  0x18   : > { %2367 = vmatmul.mubr.msk.f32.gmra.mxu0 %vm319_vm1, %v284_v6  ;;  %v309_v31 = vld [vmem:[%s2569_s8 + $0xf0] sm:$0xff]  ;;  %v310_v32 = vld [vmem:[%s2569_s8 + $0xf8] sm:$0xff]  ;;  %727 = vst.msk [vmem:[#allocation2 + $0xc0] sm:$0x1] %vm718_vm3, %v2509_v33  ;;  %728 = vst.msk [vmem:[#allocation2 + $0xd8] sm:$0x1] %vm718_vm3, %v2509_v33 }
  0x19   : > { %2369 = vmatprep.mubr.msk.f32.mxu0 %vm319_vm1, %v285_v7  ;;  %729 = vst.msk [vmem:[#allocation2 + $0xf0] sm:$0x1] %vm718_vm3, %v2509_v33  ;;  %730 = vst.msk [vmem:[#allocation2 + $0x108] sm:$0x1] %vm718_vm3, %v2509_v33  ;;  %v2690_v40 = vld [vmem:[%s3669_s3] sm:$0xff]  ;;  %v791_v55 = vld [vmem:[#allocation2 + $0x8] sm:$0xff] }
  0x1a   : > { %731 = vst.msk [vmem:[#allocation2 + $0x120] sm:$0x1] %vm718_vm3, %v2509_v33  ;;  %732 = vst.msk [vmem:[#allocation2 + $0x138] sm:$0x1] %vm718_vm3, %v2509_v33  ;;  %v2694_v44 = vrot.slane %v2690_v40, %v824_v38  ;;  %v2697_v45 = vrot.slane %v2690_v40, %v892_v39  ;;  %v790_v49 = vld [vmem:[#allocation2] sm:$0xff]  ;;  %v2705_v60 = vrot.slane %v2690_v40, %v992_v46 }
  0x1b   : > { %733 = vst.msk [vmem:[#allocation2 + $0x150] sm:$0x1] %vm718_vm3, %v2509_v33  ;;  %734 = vst.msk [vmem:[#allocation2 + $0x168] sm:$0x1] %vm718_vm3, %v2509_v33  ;;  %v858_v50 = vld [vmem:[#allocation2 + $0x1] sm:$0xff] }
  0x1c   : > { %2370 = vmatmul.mubr.msk.f32.gmra.mxu0 %vm319_vm1, %v286_v8  ;;  %735 = vst.msk [vmem:[#allocation2 + $0x180] sm:$0x1] %vm718_vm3, %v2509_v33  ;;  %738 = vst.msk [vmem:[#allocation2 + $0x29] sm:$0x1] %vm718_vm3, %v2509_v33  ;;  %v826_v58 = vmul.f32 %v2694_v44, %v790_v49  ;;  %v894_v59 = vmul.f32 %v2697_v45, %v858_v50  ;;  %v958_v1 = vld [vmem:[#allocation2 + $0x2] sm:$0xff]  ;;  %v827_v4 = vmul.f32 %v2694_v44, %v791_v55 }
  0x1d   : > { %2372 = vmatprep.mubr.msk.f32.mxu0 %vm319_vm1, %v287_v9  ;;  %739 = vst.msk [vmem:[#allocation2 + $0x41] sm:$0x1] %vm718_vm3, %v2509_v33  ;;  %740 = vst.msk [vmem:[#allocation2 + $0x59] sm:$0x1] %vm718_vm3, %v2509_v33  ;;  %v1092_v9 = vsub.s32 3, %v2678_v36 }
  0x1e   : > { %741 = vst.msk [vmem:[#allocation2 + $0x71] sm:$0x1] %vm718_vm3, %v2509_v33  ;;  %742 = vst.msk [vmem:[#allocation2 + $0x89] sm:$0x1] %vm718_vm3, %v2509_v33 }
  0x1f   : > { %743 = vst.msk [vmem:[#allocation2 + $0xa1] sm:$0x1] %vm718_vm3, %v2509_v33  ;;  %744 = vst.msk [vmem:[#allocation2 + $0xb9] sm:$0x1] %vm718_vm3, %v2509_v33 }
  0x20   : > { %2373 = vmatmul.mubr.msk.f32.gmra.mxu0 %vm319_vm1, %v288_v10  ;;  %745 = vst.msk [vmem:[#allocation2 + $0xd1] sm:$0x1] %vm718_vm3, %v2509_v33  ;;  %746 = vst.msk [vmem:[#allocation2 + $0xe9] sm:$0x1] %vm718_vm3, %v2509_v33 }
  0x21   : > { %2375 = vmatprep.mubr.msk.f32.mxu0 %vm319_vm1, %v289_v11  ;;  %747 = vst.msk [vmem:[#allocation2 + $0x101] sm:$0x1] %vm718_vm3, %v2509_v33  ;;  %748 = vst.msk [vmem:[#allocation2 + $0x119] sm:$0x1] %vm718_vm3, %v2509_v33 }
  0x22   : > { %749 = vst.msk [vmem:[#allocation2 + $0x131] sm:$0x1] %vm718_vm3, %v2509_v33  ;;  %750 = vst.msk [vmem:[#allocation2 + $0x149] sm:$0x1] %vm718_vm3, %v2509_v33 }
  0x23   : > { %751 = vst.msk [vmem:[#allocation2 + $0x161] sm:$0x1] %vm718_vm3, %v2509_v33  ;;  %752 = vst.msk [vmem:[#allocation2 + $0x179] sm:$0x1] %vm718_vm3, %v2509_v33 }
  0x24   : > { %2376 = vmatmul.mubr.msk.f32.gmra.mxu0 %vm319_vm1, %v290_v12  ;;  %753 = vst.msk [vmem:[#allocation2 + $0x191] sm:$0x1] %vm718_vm3, %v2509_v33  ;;  %736 = vst.msk [vmem:[#allocation2 + $0x198] sm:$0x1] %vm718_vm3, %v2509_v33  ;;  %v926_v12 = vadd.f32 %v894_v59, %v826_v58 }
  0x25   : > { %2378 = vmatprep.mubr.msk.f32.mxu0 %vm319_vm1, %v291_v13  ;;  %713 = vst.msk [vmem:[#allocation2 + $0x10] sm:$0x3] %vm712_vm4, %v2509_v33  ;;  %717 = vst.msk [vmem:[#allocation2 + $0x1a8] sm:$0x3] %vm712_vm4, %v2509_v33  ;;  %v994_v13 = vmul.f32 %v2705_v60, %v958_v1 }
  0x26   : > { %737 = vst.msk [vmem:[#allocation2 + $0x11] sm:$0x1] %vm718_vm3, %v2509_v33  ;;  %754 = vst.msk [vmem:[#allocation2 + $0x1a9] sm:$0x1] %vm718_vm3, %v2509_v33 }
  0x28   : > { %2379 = vmatmul.mubr.msk.f32.gmra.mxu0 %vm319_vm1, %v292_v14  ;;  %v2718_v14 = vrot.slane %v2690_v40, %v1192_v61 }
  0x29   : > { %2381 = vmatprep.mubr.msk.f32.mxu0 %vm319_vm1, %v293_v15 }
  0x2c   : > { %2382 = vmatmul.mubr.msk.f32.gmra.mxu0 %vm319_vm1, %v294_v16  ;;  %v859_v56 = vld [vmem:[#allocation2 + $0x9] sm:$0xff] }
  0x2d   : > { %2384 = vmatprep.mubr.msk.f32.mxu0 %vm319_vm1, %v295_v17  ;;  %v895_v5 = vmul.f32 %v2697_v45, %v859_v56  ;;  %v959_v10 = vld [vmem:[#allocation2 + $0xa] sm:$0xff] }
  0x30   : > { %2385 = vmatmul.mubr.msk.f32.gmra.mxu0 %vm319_vm1, %v296_v18  ;;  %v1493_v18 = vsub.s32 7, %v2678_v36 }
  0x31   : > { %2387 = vmatprep.mubr.msk.f32.mxu0 %vm319_vm1, %v297_v19 }
  0x32   : > { %v2736_v35 = vrot.slane %v2690_v40, %v1493_v18 }
  0x34   : > { %2388 = vmatmul.mubr.msk.f32.gmra.mxu0 %vm319_vm1, %v298_v20  ;;  %v2724_v20 = vrot.slane %v2690_v40, %v1292_v3 }
  0x35   : > { %2390 = vmatprep.mubr.msk.f32.mxu0 %vm319_vm1, %v299_v21  ;;  %v1393_v21 = vsub.s32 6, %v2678_v36 }
  0x38   : > { %2391 = vmatmul.mubr.msk.f32.gmra.mxu0 %vm319_vm1, %v300_v22  ;;  %v927_v22 = vadd.f32 %v895_v5, %v827_v4 }
  0x39   : > { %2393 = vmatprep.mubr.msk.f32.mxu0 %vm319_vm1, %v301_v23  ;;  %v995_v23 = vmul.f32 %v2705_v60, %v959_v10 }
  0x3c   : > { %2394 = vmatmul.mubr.msk.f32.gmra.mxu0 %vm319_vm1, %v302_v24 }
  0x3d   : > { %2396 = vmatprep.mubr.msk.f32.mxu0 %vm319_vm1, %v303_v25 }
  0x40   : > { %2397 = vmatmul.mubr.msk.f32.gmra.mxu0 %vm319_vm1, %v304_v26 }
  0x41   : > { %2399 = vmatprep.mubr.msk.f32.mxu0 %vm319_vm1, %v305_v27  ;;  %v2731_v27 = vrot.slane %v2690_v40, %v1092_v9 }
  0x44   : > { %2400 = vmatmul.mubr.msk.f32.gmra.mxu0 %vm319_vm1, %v306_v28 }
  0x45   : > { %2402 = vmatprep.mubr.msk.f32.mxu0 %vm319_vm1, %v307_v29  ;;  %v1026_v29 = vadd.f32 %v994_v13, %v926_v12 }
  0x48   : > { %2403 = vmatmul.mubr.msk.f32.gmra.mxu0 %vm319_vm1, %v308_v30 }
  0x49   : > { %2405 = vmatprep.mubr.msk.f32.mxu0 %vm319_vm1, %v309_v31 }
  0x4c   : > { %2406 = vmatmul.mubr.msk.f32.gmra.mxu0 %vm319_vm1, %v310_v32 }
  0xd0   : > { %v2362_v41 = vpop.f32.mrf.mxu0 }
  0xd1   : > { %v492_v42 = vadd.f32 %v2362_v41, %v2683_v37  ;;  %v2739_v41 = vrot.slane %v2690_v40, %v1393_v21 }
  0xd2   : > { %v486_v43 = vpop.f32.mrf.mxu0 }
  0xd3   : > { %v646_v47 = vmax.f32 %v492_v42, 0.0  ;;  %v487_v48 = vadd.f32 %v2683_v37, %v486_v43  ;;  %v1027_v42 = vadd.f32 %v995_v23, %v927_v22 }
  0xd4   : > { %v2365_v51 = vpop.f32.mrf.mxu0 }
  0xd5   : > { %v678_v52 = vmin.f32 %v646_v47, 6.0  ;;  %v645_v53 = vmax.f32 %v487_v48, 0.0  ;;  %v502_v54 = vadd.f32 %v2365_v51, %v2683_v37 }
  0xd6   : > { %v496_v57 = vpop.f32.mrf.mxu0 }
  0xd7   : > { %757 = vst.msk [vmem:[#allocation2 + $0x21] sm:$0xff] %vm709_vm2, %v678_v52  ;;  %v677_v62 = vmin.f32 %v645_v53, 6.0  ;;  %v648_v63 = vmax.f32 %v502_v54, 0.0  ;;  %v497_v0 = vadd.f32 %v2683_v37, %v496_v57 }
  0xd8   : > { %v2368_v2 = vpop.f32.mrf.mxu0 }
  0xd9   : > { %756 = vst.msk [vmem:[#allocation2 + $0x19] sm:$0xff] %vm709_vm2, %v677_v62  ;;  %v680_v6 = vmin.f32 %v648_v63, 6.0  ;;  %v647_v7 = vmax.f32 %v497_v0, 0.0  ;;  %v512_v8 = vadd.f32 %v2368_v2, %v2683_v37 }
  0xda   : > { %v506_v11 = vpop.f32.mrf.mxu0 }
  0xdb   : > { %759 = vst.msk [vmem:[#allocation2 + $0x39] sm:$0xff] %vm709_vm2, %v680_v6  ;;  %v679_v15 = vmin.f32 %v647_v7, 6.0  ;;  %v650_v16 = vmax.f32 %v512_v8, 0.0  ;;  %v507_v17 = vadd.f32 %v2683_v37, %v506_v11 }
  0xdc   : > { %v2371_v19 = vpop.f32.mrf.mxu0 }
  0xdd   : > { %758 = vst.msk [vmem:[#allocation2 + $0x31] sm:$0xff] %vm709_vm2, %v679_v15  ;;  %v682_v24 = vmin.f32 %v650_v16, 6.0  ;;  %v649_v25 = vmax.f32 %v507_v17, 0.0  ;;  %v522_v26 = vadd.f32 %v2371_v19, %v2683_v37 }
  0xde   : > { %v516_v28 = vpop.f32.mrf.mxu0  ;;  %v1159_v30 = vld [vmem:[#allocation2 + $0x21] sm:$0xff] }
  0xdf   : > { %v1259_v31 = vld [vmem:[#allocation2 + $0x22] sm:$0xff]  ;;  %761 = vst.msk [vmem:[#allocation2 + $0x51] sm:$0xff] %vm709_vm2, %v682_v24  ;;  %v681_v32 = vmin.f32 %v649_v25, 6.0  ;;  %v652_v33 = vmax.f32 %v522_v26, 0.0  ;;  %v517_v34 = vadd.f32 %v2683_v37, %v516_v28  ;;  %v1195_v43 = vmul.f32 %v2718_v14, %v1159_v30 }
  0xe0   : > { %v2374_v36 = vpop.f32.mrf.mxu0  ;;  %v1058_v38 = vld [vmem:[#allocation2 + $0x18] sm:$0xff]  ;;  %v1295_v46 = vmul.f32 %v2724_v20, %v1259_v31  ;;  %v2746_v52 = vld [vmem:[#allocation2 + $0x20] sm:$0xff]  ;;  %v2752_v55 = vmul.f32 %v1159_v30, %v2697_v45  ;;  %v2755_v56 = vmul.f32 %v1259_v31, %v2705_v60 }
  0xe1   : > { %v1158_v39 = vld [vmem:[#allocation2 + $0x19] sm:$0xff]  ;;  %760 = vst.msk [vmem:[#allocation2 + $0x49] sm:$0xff] %vm709_vm2, %v681_v32  ;;  %v684_v47 = vmin.f32 %v652_v33, 6.0  ;;  %v651_v48 = vmax.f32 %v517_v34, 0.0  ;;  %v532_v49 = vadd.f32 %v2374_v36, %v2683_v37  ;;  %v1094_v50 = vmul.f32 %v2731_v27, %v1058_v38  ;;  %v2790_v32 = vld [vmem:[%s3669_s3 + $0x8] ss:$0 sm:$0xff] }
  0xe2   : > { %v1258_v51 = vld [vmem:[#allocation2 + $0x1a] sm:$0xff]  ;;  %v526_v53 = vpop.f32.mrf.mxu0  ;;  %v1194_v40 = vmul.f32 %v2718_v14, %v1158_v39  ;;  %v1095_v54 = vmul.f32 %v2731_v27, %v2746_v52  ;;  %v828_v4 = vmul.f32 %v1058_v38, %v2694_v44  ;;  %v896_v5 = vmul.f32 %v1158_v39, %v2697_v45 }
  0xe3   : > { %763 = vst.msk [vmem:[#allocation2 + $0x69] sm:$0xff] %vm709_vm2, %v684_v47  ;;  %v683_v57 = vmin.f32 %v651_v48, 6.0  ;;  %v654_v58 = vmax.f32 %v532_v49, 0.0  ;;  %v527_v59 = vadd.f32 %v2683_v37, %v526_v53  ;;  %v1126_v61 = vadd.f32 %v1094_v50, %v1026_v29  ;;  %v2759_v62 = vld [vmem:[#allocation2 + $0x39] sm:$0xff] }
  0xe4   : > { %v2377_v63 = vpop.f32.mrf.mxu0  ;;  %v1294_v0 = vmul.f32 %v2724_v20, %v1258_v51  ;;  %v2762_v1 = vld [vmem:[#allocation2 + $0x30] sm:$0xff]  ;;  %v1127_v3 = vadd.f32 %v1095_v54, %v1027_v42  ;;  %v2770_v10 = vld [vmem:[#allocation2 + $0x38] sm:$0xff]  ;;  %v1496_v16 = vmul.f32 %v2736_v35, %v2759_v62  ;;  %v928_v26 = vadd.f32 %v896_v5, %v828_v4  ;;  %v2805_v53 = vld [vmem:[%s3670_s4] ss:$0 sm:$0xff] }
  0xe5   : > { %v2764_v2 = vld [vmem:[#allocation2 + $0x31] sm:$0xff]  ;;  %762 = vst.msk [vmem:[#allocation2 + $0x61] sm:$0xff] %vm709_vm2, %v683_v57  ;;  %v686_v6 = vmin.f32 %v654_v58, 6.0  ;;  %v653_v7 = vmax.f32 %v527_v59, 0.0  ;;  %v542_v8 = vadd.f32 %v2377_v63, %v2683_v37  ;;  %v1226_v9 = vadd.f32 %v1194_v40, %v1126_v61  ;;  %v2792_v34 = vld [vmem:[#allocation2 + $0x3a] sm:$0xff] }
  0xe6   : > { %v536_v11 = vpop.f32.mrf.mxu0  ;;  %v1395_v12 = vmul.f32 %v2739_v41, %v2762_v1  ;;  %v1495_v13 = vmul.f32 %v2736_v35, %v2764_v2  ;;  %v1227_v15 = vadd.f32 %v1195_v43, %v1127_v3  ;;  %v2780_v22 = vld [vmem:[#allocation2 + $0x32] sm:$0xff]  ;;  %v1396_v25 = vmul.f32 %v2739_v41, %v2770_v10 }
  0xe7   : > { %765 = vst.msk [vmem:[#allocation2 + $0x81] sm:$0xff] %vm709_vm2, %v686_v6  ;;  %v685_v17 = vmin.f32 %v653_v7, 6.0  ;;  %v656_v18 = vmax.f32 %v542_v8, 0.0  ;;  %v537_v19 = vadd.f32 %v2683_v37, %v536_v11  ;;  %v1326_v21 = vadd.f32 %v1294_v0, %v1226_v9 }
  0xe8   : > { %v2380_v23 = vpop.f32.mrf.mxu0  ;;  %v1327_v24 = vadd.f32 %v1295_v46, %v1227_v15  ;;  %v996_v28 = vmul.f32 %v1258_v51, %v2705_v60  ;;  %v1595_v38 = vmul.f32 %v2790_v32, %v2780_v22  ;;  %v1096_v43 = vmul.f32 %v2762_v1, %v2731_v27  ;;  %v2800_v50 = vld [vmem:[#allocation2 + $0x48] sm:$0xff] }
  0xe9   : > { %764 = vst.msk [vmem:[#allocation2 + $0x79] sm:$0xff] %vm709_vm2, %v685_v17  ;;  %v688_v29 = vmin.f32 %v656_v18, 6.0  ;;  %v655_v30 = vmax.f32 %v537_v19, 0.0  ;;  %v552_v31 = vadd.f32 %v2380_v23, %v2683_v37  ;;  %v1427_v33 = vadd.f32 %v1395_v12, %v1326_v21  ;;  %v2813_v3 = vld [vmem:[#allocation2 + $0x49] sm:$0xff] }
  0xea   : > { %v546_v36 = vpop.f32.mrf.mxu0  ;;  %v1428_v39 = vadd.f32 %v1396_v25, %v1327_v24  ;;  %v1028_v42 = vadd.f32 %v996_v28, %v928_v26  ;;  %v1596_v54 = vmul.f32 %v2790_v32, %v2792_v34  ;;  %v1196_v58 = vmul.f32 %v2764_v2, %v2718_v14  ;;  %v2829_v26 = vld [vmem:[#allocation2 + $0x4a] sm:$0xff] }
  0xeb   : > { %767 = vst.msk [vmem:[#allocation2 + $0x99] sm:$0xff] %vm709_vm2, %v688_v29  ;;  %v687_v46 = vmin.f32 %v655_v30, 6.0  ;;  %v658_v47 = vmax.f32 %v552_v31, 0.0  ;;  %v547_v48 = vadd.f32 %v2683_v37, %v546_v36  ;;  %v1527_v49 = vadd.f32 %v1495_v13, %v1427_v33 }
  0xec   : > { %v2383_v51 = vpop.f32.mrf.mxu0  ;;  %v1528_v40 = vadd.f32 %v1496_v16, %v1428_v39  ;;  %v1128_v57 = vadd.f32 %v1096_v43, %v1028_v42  ;;  %v1296_v7 = vmul.f32 %v2780_v22, %v2724_v20  ;;  %v1397_v8 = vmul.f32 %v2739_v41, %v2800_v50 }
  0xed   : > { %766 = vst.msk [vmem:[#allocation2 + $0x91] sm:$0xff] %vm709_vm2, %v687_v46  ;;  %v690_v59 = vmin.f32 %v658_v47, 6.0  ;;  %v657_v61 = vmax.f32 %v547_v48, 0.0  ;;  %v562_v63 = vadd.f32 %v2383_v51, %v2683_v37  ;;  %v1627_v0 = vadd.f32 %v1595_v38, %v1527_v49 }
  0xee   : > { %v556_v4 = vpop.f32.mrf.mxu0  ;;  %v1628_v5 = vadd.f32 %v1596_v54, %v1528_v40  ;;  %v1228_v6 = vadd.f32 %v1196_v58, %v1128_v57  ;;  %v1497_v18 = vmul.f32 %v2736_v35, %v2813_v3  ;;  %v829_v19 = vmul.f32 %v2746_v52, %v2694_v44  ;;  %v2842_v40 = vld [vmem:[#allocation2 + $0x50] sm:$0xff] }
  0xef   : > { %769 = vst.msk [vmem:[#allocation2 + $0xb1] sm:$0xff] %vm709_vm2, %v690_v59  ;;  %v689_v9 = vmin.f32 %v657_v61, 6.0  ;;  %v660_v11 = vmax.f32 %v562_v63, 0.0  ;;  %v557_v12 = vadd.f32 %v2683_v37, %v556_v4  ;;  %v1666_v13 = vadd.f32 %v2805_v53, %v1627_v0 }
  0xf0   : > { %v2386_v15 = vpop.f32.mrf.mxu0  ;;  %v1667_v16 = vadd.f32 %v2805_v53, %v1628_v5  ;;  %v1328_v17 = vadd.f32 %v1296_v7, %v1228_v6  ;;  %v929_v31 = vadd.f32 %v2752_v55, %v829_v19  ;;  %v1097_v33 = vmul.f32 %v2770_v10, %v2731_v27  ;;  %v2864_v19 = vld [vmem:[#allocation2 + $0x52] sm:$0xff] }
  0xf1   : > { %768 = vst.msk [vmem:[#allocation2 + $0xa9] sm:$0xff] %vm709_vm2, %v689_v9  ;;  %v692_v21 = vmin.f32 %v660_v11, 6.0  ;;  %v659_v23 = vmax.f32 %v557_v12, 0.0  ;;  %v572_v24 = vadd.f32 %v2386_v15, %v2683_v37  ;;  %v1698_v25 = vmax.f32 %v1666_v13, 0.0  ;;  %v2860_v15 = vld [vmem:[#allocation2 + $0x51] sm:$0xff] }
  0xf2   : > { %v566_v28 = vpop.f32.mrf.mxu0  ;;  %v1699_v29 = vmax.f32 %v1667_v16, 0.0  ;;  %v1429_v30 = vadd.f32 %v1397_v8, %v1328_v17  ;;  %v1597_v47 = vmul.f32 %v2790_v32, %v2829_v26  ;;  %v1029_v48 = vadd.f32 %v2755_v56, %v929_v31 }
  0xf3   : > { %771 = vst.msk [vmem:[#allocation2 + $0xc9] sm:$0xff] %vm709_vm2, %v692_v21  ;;  %v691_v52 = vmin.f32 %v659_v23, 6.0  ;;  %v662_v36 = vmax.f32 %v572_v24, 0.0  ;;  %v567_v38 = vadd.f32 %v2683_v37, %v566_v28  ;;  %v1730_v39 = vmin.f32 %v1698_v25, 6.0 }
  0xf4   : > { %v2389_v42 = vpop.f32.mrf.mxu0  ;;  %v1731_v43 = vmin.f32 %v1699_v29, 6.0  ;;  %v1529_v46 = vadd.f32 %v1497_v18, %v1429_v30  ;;  %v1129_v58 = vadd.f32 %v1097_v33, %v1029_v48  ;;  %v1197_v59 = vmul.f32 %v2759_v62, %v2718_v14 }
  0xf5   : > { %770 = vst.msk [vmem:[#allocation2 + $0xc1] sm:$0xff] %vm709_vm2, %v691_v52  ;;  %v694_v55 = vmin.f32 %v662_v36, 6.0  ;;  %v661_v49 = vmax.f32 %v567_v38, 0.0  ;;  %v582_v51 = vadd.f32 %v2389_v42, %v2683_v37  ;;  %2410 = vmatprep.mubr.msk.f32.mxu1 %vm709_vm2, %v1730_v39  ;;  %v1297_v56 = vmul.f32 %v2792_v34, %v2724_v20 }
  0xf6   : > { %v576_v54 = vpop.f32.mrf.mxu0  ;;  %2411 = vmatmul.mubr.msk.f32.vlgmr.msra.gmra.mxu1 %vm709_vm2, %v1731_v43  ;;  %v1629_v57 = vadd.f32 %v1597_v47, %v1529_v46  ;;  %v830_v4 = vmul.f32 %v2762_v1, %v2694_v44  ;;  %v1229_v7 = vadd.f32 %v1197_v59, %v1129_v58  ;;  %v1398_v8 = vmul.f32 %v2739_v41, %v2842_v40 }
  0xf7   : > { %773 = vst.msk [vmem:[#allocation2 + $0xe1] sm:$0xff] %vm709_vm2, %v694_v55  ;;  %v693_v61 = vmin.f32 %v661_v49, 6.0  ;;  %v664_v63 = vmax.f32 %v582_v51, 0.0  ;;  %v577_v0 = vadd.f32 %v2683_v37, %v576_v54  ;;  %v898_v9 = vmul.f32 %v2764_v2, %v2697_v45  ;;  %v2882_v49 = vld [vmem:[#allocation2 + $0x60] sm:$0xff] }
  0xf8   : > { %v2392_v5 = vpop.f32.mrf.mxu0  ;;  %v1668_v6 = vadd.f32 %v2805_v53, %v1629_v57  ;;  %v998_v1 = vmul.f32 %v2780_v22, %v2705_v60  ;;  %v1329_v18 = vadd.f32 %v1297_v56, %v1229_v7  ;;  %v1098_v2 = vmul.f32 %v2800_v50, %v2731_v27  ;;  %v2884_v51 = vld [vmem:[#allocation2 + $0x61] sm:$0xff] }
  0xf9   : > { %772 = vst.msk [vmem:[#allocation2 + $0xd9] sm:$0xff] %vm709_vm2, %v693_v61  ;;  %v696_v11 = vmin.f32 %v664_v63, 6.0  ;;  %v663_v12 = vmax.f32 %v577_v0, 0.0  ;;  %v592_v13 = vadd.f32 %v2392_v5, %v2683_v37  ;;  %v930_v21 = vadd.f32 %v898_v9, %v830_v4  ;;  %v2891_v61 = vld [vmem:[#allocation2 + $0x62] sm:$0xff] }
  0xfa   : > { %v1700_v16 = vmax.f32 %v1668_v6, 0.0  ;;  %v586_v17 = vpop.f32.mrf.mxu0  ;;  %v1430_v29 = vadd.f32 %v1398_v8, %v1329_v18  ;;  %v1498_v22 = vmul.f32 %v2736_v35, %v2860_v15  ;;  %v1598_v36 = vmul.f32 %v2790_v32, %v2864_v19 }
  0xfb   : > { %775 = vst.msk [vmem:[#allocation2 + $0xf9] sm:$0xff] %vm709_vm2, %v696_v11  ;;  %v695_v23 = vmin.f32 %v663_v12, 6.0  ;;  %v666_v24 = vmax.f32 %v592_v13, 0.0  ;;  %v587_v25 = vadd.f32 %v2683_v37, %v586_v17  ;;  %v1030_v31 = vadd.f32 %v998_v1, %v930_v21  ;;  %v2903_v11 = vld [vmem:[#allocation2 + $0x68] sm:$0xff] }
  0xfc   : > { %v1732_v28 = vmin.f32 %v1700_v16, 6.0  ;;  %v2395_v30 = vpop.f32.mrf.mxu0  ;;  %v1530_v39 = vadd.f32 %v1498_v22, %v1430_v29  ;;  %v1198_v43 = vmul.f32 %v2813_v3, %v2718_v14  ;;  %v831_v47 = vmul.f32 %v2770_v10, %v2694_v44  ;;  %v2910_v16 = vld [vmem:[#allocation2 + $0x69] sm:$0xff] }
  0xfd   : > { %774 = vst.msk [vmem:[#allocation2 + $0xf1] sm:$0xff] %vm709_vm2, %v695_v23  ;;  %v698_v33 = vmin.f32 %v666_v24, 6.0  ;;  %v665_v52 = vmax.f32 %v587_v25, 0.0  ;;  %v602_v38 = vadd.f32 %v2395_v30, %v2683_v37  ;;  %v1130_v42 = vadd.f32 %v1098_v2, %v1030_v31 }
  0xfe   : > { %2413 = vmatprep.mubr.msk.f32.mxu1 %vm709_vm2, %v1732_v28  ;;  %v596_v46 = vpop.f32.mrf.mxu0  ;;  %v899_v57 = vmul.f32 %v2759_v62, %v2697_v45  ;;  %v1630_v58 = vadd.f32 %v1598_v36, %v1530_v39  ;;  %v1298_v56 = vmul.f32 %v2829_v26, %v2724_v20  ;;  %v999_v10 = vmul.f32 %v2792_v34, %v2705_v60  ;;  %v2920_v28 = vld [vmem:[#allocation2 + $0x6a] sm:$0xff] }
  0xff   : > { %777 = vst.msk [vmem:[#allocation2 + $0x111] sm:$0xff] %vm709_vm2, %v698_v33  ;;  %v697_v48 = vmin.f32 %v665_v52, 6.0  ;;  %v668_v55 = vmax.f32 %v602_v38, 0.0  ;;  %v597_v54 = vadd.f32 %v2683_v37, %v596_v46  ;;  %v1230_v59 = vadd.f32 %v1198_v43, %v1130_v42  ;;  %v2930_v42 = vld [vmem:[#allocation2 + $0x78] sm:$0xff] }
 0x100   : > { %v931_v4 = vadd.f32 %v899_v57, %v831_v47  ;;  %v1099_v5 = vmul.f32 %v2842_v40, %v2731_v27  ;;  %v2398_v6 = vpop.f32.mrf.mxu0  ;;  %v1669_v62 = vadd.f32 %v2805_v53, %v1630_v58  ;;  %v1399_v8 = vmul.f32 %v2739_v41, %v2882_v49 }
 0x101   : > { %776 = vst.msk [vmem:[#allocation2 + $0x109] sm:$0xff] %vm709_vm2, %v697_v48  ;;  %v700_v63 = vmin.f32 %v668_v55, 6.0  ;;  %v667_v0 = vmax.f32 %v597_v54, 0.0  ;;  %v1330_v7 = vadd.f32 %v1298_v56, %v1230_v59  ;;  %v1499_v9 = vmul.f32 %v2736_v35, %v2884_v51  ;;  %v2937_v48 = vld [vmem:[#allocation2 + $0x79] sm:$0xff] }
 0x102   : > { %v1599_v34 = vmul.f32 %v2790_v32, %v2891_v61  ;;  %v1031_v13 = vadd.f32 %v999_v10, %v931_v4  ;;  %v1199_v1 = vmul.f32 %v2860_v15, %v2718_v14  ;;  %v1701_v17 = vmax.f32 %v1669_v62, 0.0  ;;  %v606_v33 = vpop.f32.mrf.mxu0  ;;  %v2948_v10 = vld [vmem:[#allocation2 + $0x7a] sm:$0xff] }
 0x103   : > { %779 = vst.msk [vmem:[#allocation2 + $0x129] sm:$0xff] %vm709_vm2, %v700_v63  ;;  %v699_v12 = vmin.f32 %v667_v0, 6.0  ;;  %v1431_v18 = vadd.f32 %v1399_v8, %v1330_v7  ;;  %v612_v21 = vadd.f32 %v2398_v6, %v2683_v37  ;;  %v832_v2 = vmul.f32 %v2800_v50, %v2694_v44 }
 0x104   : > { %v1131_v23 = vadd.f32 %v1099_v5, %v1031_v13  ;;  %v1299_v24 = vmul.f32 %v2864_v19, %v2724_v20  ;;  %v1400_v25 = vmul.f32 %v2739_v41, %v2903_v11  ;;  %v900_v29 = vmul.f32 %v2813_v3, %v2697_v45  ;;  %v2401_v6 = vpop.f32.mrf.mxu0 }
 0x105   : > { %778 = vst.msk [vmem:[#allocation2 + $0x121] sm:$0xff] %vm709_vm2, %v699_v12  ;;  %v1733_v22 = vmin.f32 %v1701_v17, 6.0  ;;  %v1531_v30 = vadd.f32 %v1499_v9, %v1431_v18  ;;  %v1500_v31 = vmul.f32 %v2736_v35, %v2910_v16  ;;  %v670_v50 = vmax.f32 %v612_v21, 0.0 }
 0x106   : > { %v1231_v52 = vadd.f32 %v1199_v1, %v1131_v23  ;;  %v932_v36 = vadd.f32 %v900_v29, %v832_v2  ;;  %v1000_v38 = vmul.f32 %v2829_v26, %v2705_v60  ;;  %v1100_v39 = vmul.f32 %v2882_v49, %v2731_v27 }
 0x107   : > { %2414 = vmatmul.mubr.msk.f32.gmra.mxu1 %vm709_vm2, %v1733_v22  ;;  %v1631_v3 = vadd.f32 %v1599_v34, %v1531_v30  ;;  %v1600_v43 = vmul.f32 %v2790_v32, %v2920_v28  ;;  %v702_v46 = vmin.f32 %v670_v50, 6.0  ;;  %v1200_v47 = vmul.f32 %v2884_v51, %v2718_v14 }
 0x108   : > { %v1331_v55 = vadd.f32 %v1299_v24, %v1231_v52  ;;  %v1032_v54 = vadd.f32 %v1000_v38, %v932_v36  ;;  %v607_v26 = vadd.f32 %v2683_v37, %v606_v33  ;;  %v833_v57 = vmul.f32 %v2842_v40, %v2694_v44  ;;  %v2966_v24 = vld [vmem:[#allocation2 + $0x81] sm:$0xff] }
 0x109   : > { %v1670_v58 = vadd.f32 %v2805_v53, %v1631_v3  ;;  %781 = vst.msk [vmem:[#allocation2 + $0x141] sm:$0xff] %vm709_vm2, %v702_v46  ;;  %v1300_v59 = vmul.f32 %v2891_v61, %v2724_v20  ;;  %v1401_v56 = vmul.f32 %v2739_v41, %v2930_v42  ;;  %v901_v63 = vmul.f32 %v2860_v15, %v2697_v45 }
 0x10a   : > { %v1432_v0 = vadd.f32 %v1400_v25, %v1331_v55  ;;  %v1132_v4 = vadd.f32 %v1100_v39, %v1032_v54  ;;  %v1501_v40 = vmul.f32 %v2736_v35, %v2937_v48  ;;  %v669_v5 = vmax.f32 %v607_v26, 0.0 }
 0x10b   : > { %v1702_v62 = vmax.f32 %v1670_v58, 0.0  ;;  %v933_v7 = vadd.f32 %v901_v63, %v833_v57  ;;  %v1001_v8 = vmul.f32 %v2864_v19, %v2705_v60  ;;  %v1101_v9 = vmul.f32 %v2903_v11, %v2731_v27  ;;  %v2964_v19 = vld [vmem:[#allocation2 + $0x80] sm:$0xff] }
 0x10c   : > { %v1532_v34 = vadd.f32 %v1500_v31, %v1432_v0  ;;  %v1232_v12 = vadd.f32 %v1200_v47, %v1132_v4  ;;  %v1601_v15 = vmul.f32 %v2790_v32, %v2948_v10  ;;  %v701_v13 = vmin.f32 %v669_v5, 6.0  ;;  %v2975_v31 = vld [vmem:[#allocation2 + $0x82] sm:$0xff]  ;;  %v2994_v4 = vld [vmem:[#allocation2 + $0x90] sm:$0xff] }
 0x10d   : > { %v1734_v1 = vmin.f32 %v1702_v62, 6.0  ;;  %v1033_v17 = vadd.f32 %v1001_v8, %v933_v7  ;;  %v1201_v18 = vmul.f32 %v2910_v16, %v2718_v14  ;;  %v622_v21 = vadd.f32 %v2401_v6, %v2683_v37  ;;  %v3002_v7 = vld [vmem:[#allocation2 + $0x92] sm:$0xff] }
 0x10e   : > { %v1632_v2 = vadd.f32 %v1600_v43, %v1532_v34  ;;  %v1332_v23 = vadd.f32 %v1300_v59, %v1232_v12  ;;  %780 = vst.msk [vmem:[#allocation2 + $0x139] sm:$0xff] %vm709_vm2, %v701_v13  ;;  %v834_v25 = vmul.f32 %v2882_v49, %v2694_v44  ;;  %v902_v29 = vmul.f32 %v2884_v51, %v2697_v45  ;;  %v616_v51 = vpop.f32.mrf.mxu0 }
 0x10f   : > { %2416 = vmatprep.mubr.msk.f32.mxu1 %vm709_vm2, %v1734_v1  ;;  %v1133_v22 = vadd.f32 %v1101_v9, %v1033_v17  ;;  %v1301_v30 = vmul.f32 %v2920_v28, %v2724_v20  ;;  %v672_v50 = vmax.f32 %v622_v21, 0.0  ;;  %v1002_v33 = vmul.f32 %v2891_v61, %v2705_v60 }
 0x110   : > { %v1671_v52 = vadd.f32 %v2805_v53, %v1632_v2  ;;  %v1433_v36 = vadd.f32 %v1401_v56, %v1332_v23  ;;  %v934_v38 = vadd.f32 %v902_v29, %v834_v25  ;;  %v1102_v49 = vmul.f32 %v2930_v42, %v2731_v27 }
 0x111   : > { %v1233_v39 = vadd.f32 %v1201_v18, %v1133_v22  ;;  %v1402_v3 = vmul.f32 %v2739_v41, %v2964_v19  ;;  %v1502_v43 = vmul.f32 %v2736_v35, %v2966_v24  ;;  %v704_v46 = vmin.f32 %v672_v50, 6.0 }
 0x112   : > { %v1703_v47 = vmax.f32 %v1671_v52, 0.0  ;;  %v1533_v55 = vadd.f32 %v1501_v40, %v1433_v36  ;;  %v1602_v61 = vmul.f32 %v2790_v32, %v2975_v31  ;;  %v1034_v54 = vadd.f32 %v1002_v33, %v934_v38  ;;  %v2996_v40 = vld [vmem:[#allocation2 + $0x91] sm:$0xff]  ;;  %v3024_v38 = vld [vmem:[#allocation2 + $0x99] sm:$0xff] }
 0x113   : > { %v1333_v26 = vadd.f32 %v1301_v30, %v1233_v39  ;;  %783 = vst.msk [vmem:[#allocation2 + $0x159] sm:$0xff] %vm709_vm2, %v704_v46  ;;  %v1202_v57 = vmul.f32 %v2937_v48, %v2718_v14  ;;  %v617_v58 = vadd.f32 %v2683_v37, %v616_v51  ;;  %v835_v59 = vmul.f32 %v2903_v11, %v2694_v44  ;;  %v3022_v36 = vld [vmem:[#allocation2 + $0x98] sm:$0xff] }
 0x114   : > { %v1735_v56 = vmin.f32 %v1703_v47, 6.0  ;;  %v1633_v63 = vadd.f32 %v1601_v15, %v1533_v55  ;;  %v1134_v0 = vadd.f32 %v1102_v49, %v1034_v54  ;;  %v903_v5 = vmul.f32 %v2910_v16, %v2697_v45  ;;  %v2404_v16 = vpop.f32.mrf.mxu0 }
 0x115   : > { %v1434_v6 = vadd.f32 %v1402_v3, %v1333_v26  ;;  %v1302_v62 = vmul.f32 %v2948_v10, %v2724_v20  ;;  %v671_v8 = vmax.f32 %v617_v58, 0.0  ;;  %v1003_v11 = vmul.f32 %v2920_v28, %v2705_v60  ;;  %v3031_v3 = vld [vmem:[#allocation2 + $0x9a] sm:$0xff] }
 0x116   : > { %2417 = vmatmul.mubr.msk.f32.gmra.mxu1 %vm709_vm2, %v1735_v56  ;;  %v1672_v9 = vadd.f32 %v2805_v53, %v1633_v63  ;;  %v1234_v34 = vadd.f32 %v1202_v57, %v1134_v0  ;;  %v935_v12 = vadd.f32 %v903_v5, %v835_v59  ;;  %v1103_v15 = vmul.f32 %v2964_v19, %v2731_v27 }
 0x117   : > { %v1534_v13 = vadd.f32 %v1502_v43, %v1434_v6  ;;  %v1403_v1 = vmul.f32 %v2739_v41, %v2994_v4  ;;  %v1503_v17 = vmul.f32 %v2736_v35, %v2996_v40  ;;  %v703_v18 = vmin.f32 %v671_v8, 6.0 }
 0x118   : > { %v1704_v21 = vmax.f32 %v1672_v9, 0.0  ;;  %v1334_v28 = vadd.f32 %v1302_v62, %v1234_v34  ;;  %v1603_v2 = vmul.f32 %v2790_v32, %v3002_v7  ;;  %v1035_v23 = vadd.f32 %v1003_v11, %v935_v12  ;;  %v3051_v34 = vld [vmem:[#allocation2 + $0xa8] sm:$0xff] }
 0x119   : > { %v1634_v25 = vadd.f32 %v1602_v61, %v1534_v13  ;;  %782 = vst.msk [vmem:[#allocation2 + $0x151] sm:$0xff] %vm709_vm2, %v703_v18  ;;  %v1203_v29 = vmul.f32 %v2966_v24, %v2718_v14  ;;  %v632_v22 = vadd.f32 %v2404_v16, %v2683_v37  ;;  %v836_v30 = vmul.f32 %v2930_v42, %v2694_v44  ;;  %v3053_v12 = vld [vmem:[#allocation2 + $0xa9] sm:$0xff] }
 0x11a   : > { %v1736_v50 = vmin.f32 %v1704_v21, 6.0  ;;  %v1435_v33 = vadd.f32 %v1403_v1, %v1334_v28  ;;  %v1135_v52 = vadd.f32 %v1103_v15, %v1035_v23  ;;  %v904_v49 = vmul.f32 %v2937_v48, %v2697_v45  ;;  %v626_v48 = vpop.f32.mrf.mxu0  ;;  %v3064_v28 = vld [vmem:[#allocation2 + $0xaa] sm:$0xff] }
 0x11b   : > { %v1673_v51 = vadd.f32 %v2805_v53, %v1634_v25  ;;  %v1303_v39 = vmul.f32 %v2975_v31, %v2724_v20  ;;  %v674_v43 = vmax.f32 %v632_v22, 0.0  ;;  %v1004_v42 = vmul.f32 %v2948_v10, %v2705_v60 }
 0x11c   : > { %2419 = vmatprep.mubr.msk.f32.mxu1 %vm709_vm2, %v1736_v50  ;;  %v1535_v46 = vadd.f32 %v1503_v17, %v1435_v33  ;;  %v1235_v47 = vadd.f32 %v1203_v29, %v1135_v52  ;;  %v936_v55 = vadd.f32 %v904_v49, %v836_v30  ;;  %v1104_v61 = vmul.f32 %v2994_v4, %v2731_v27  ;;  %v2407_v23 = vpop.f32.mrf.mxu0 }
 0x11d   : > { %v1705_v54 = vmax.f32 %v1673_v51, 0.0  ;;  %v1404_v26 = vmul.f32 %v2739_v41, %v3022_v36  ;;  %v1504_v57 = vmul.f32 %v2736_v35, %v3024_v38  ;;  %v706_v58 = vmin.f32 %v674_v43, 6.0 }
 0x11e   : > { %v1635_v59 = vadd.f32 %v1603_v2, %v1535_v46  ;;  %v1335_v56 = vadd.f32 %v1303_v39, %v1235_v47  ;;  %v1604_v10 = vmul.f32 %v2790_v32, %v3031_v3  ;;  %v1036_v63 = vadd.f32 %v1004_v42, %v936_v55  ;;  %v3082_v47 = vld [vmem:[#allocation2 + $0xb0] sm:$0xff] }
 0x11f   : > { %v1737_v0 = vmin.f32 %v1705_v54, 6.0  ;;  %785 = vst.msk [vmem:[#allocation2 + $0x171] sm:$0xff] %vm709_vm2, %v706_v58  ;;  %v1204_v5 = vmul.f32 %v2996_v40, %v2718_v14  ;;  %v627_v6 = vadd.f32 %v2683_v37, %v626_v48  ;;  %v837_v62 = vmul.f32 %v2964_v19, %v2694_v44  ;;  %v3084_v55 = vld [vmem:[#allocation2 + $0xb1] sm:$0xff] }
 0x120   : > { %v1674_v8 = vadd.f32 %v2805_v53, %v1635_v59  ;;  %v1436_v11 = vadd.f32 %v1404_v26, %v1335_v56  ;;  %v1136_v9 = vadd.f32 %v1104_v61, %v1036_v63  ;;  %v905_v15 = vmul.f32 %v2966_v24, %v2697_v45  ;;  %v636_v59 = vpop.f32.mrf.mxu0 }
 0x121   : > { %2420 = vmatmul.mubr.msk.f32.gmra.mxu1 %vm709_vm2, %v1737_v0  ;;  %v1304_v16 = vmul.f32 %v3002_v7, %v2724_v20  ;;  %v673_v13 = vmax.f32 %v627_v6, 0.0  ;;  %v1005_v19 = vmul.f32 %v2975_v31, %v2705_v60  ;;  %v1105_v1 = vmul.f32 %v3022_v36, %v2731_v27 }
 0x122   : > { %v1706_v17 = vmax.f32 %v1674_v8, 0.0  ;;  %v1536_v18 = vadd.f32 %v1504_v57, %v1436_v11  ;;  %v1236_v21 = vadd.f32 %v1204_v5, %v1136_v9  ;;  %v937_v2 = vadd.f32 %v905_v15, %v837_v62  ;;  %v1570_v8 = vld [vmem:[#allocation2 + $0xb2] sm:$0xff] }
 0x123   : > { %v1405_v24 = vmul.f32 %v2739_v41, %v3051_v34  ;;  %v1505_v25 = vmul.f32 %v2736_v35, %v3053_v12  ;;  %v705_v29 = vmin.f32 %v673_v13, 6.0  ;;  %v1605_v33 = vmul.f32 %v2790_v32, %v3064_v28 }
 0x124   : > { %v1738_v22 = vmin.f32 %v1706_v17, 6.0  ;;  %v1636_v30 = vadd.f32 %v1604_v10, %v1536_v18  ;;  %v1336_v31 = vadd.f32 %v1304_v16, %v1236_v21  ;;  %v1037_v50 = vadd.f32 %v1005_v19, %v937_v2  ;;  %v3108_v17 = vld [vmem:[#allocation2 + $0xc0] sm:$0xff] }
 0x125   : > { %784 = vst.msk [vmem:[#allocation2 + $0x169] sm:$0xff] %vm709_vm2, %v705_v29  ;;  %v642_v52 = vadd.f32 %v2407_v23, %v2683_v37  ;;  %v838_v49 = vmul.f32 %v2994_v4, %v2694_v44  ;;  %v906_v51 = vmul.f32 %v2996_v40, %v2697_v45  ;;  %v1205_v46 = vmul.f32 %v3024_v38, %v2718_v14  ;;  %v3112_v21 = vld [vmem:[#allocation2 + $0xc1] sm:$0xff] }
 0x126   : > { %2422 = vmatprep.mubr.msk.f32.mxu1 %vm709_vm2, %v1738_v22  ;;  %v1675_v39 = vadd.f32 %v2805_v53, %v1636_v30  ;;  %v1437_v43 = vadd.f32 %v1405_v24, %v1336_v31  ;;  %v1137_v42 = vadd.f32 %v1105_v1, %v1037_v50  ;;  %v1006_v4 = vmul.f32 %v3002_v7, %v2705_v60  ;;  %v3119_v30 = vld [vmem:[#allocation2 + $0xc2] sm:$0xff] }
 0x127   : > { %v676_v61 = vmax.f32 %v642_v52, 0.0  ;;  %v938_v48 = vadd.f32 %v906_v51, %v838_v49  ;;  %v1106_v40 = vmul.f32 %v3051_v34, %v2731_v27  ;;  %v1305_v58 = vmul.f32 %v3031_v3, %v2724_v20 }
 0x128   : > { %v1707_v54 = vmax.f32 %v1675_v39, 0.0  ;;  %v1537_v26 = vadd.f32 %v1505_v25, %v1437_v43  ;;  %v1237_v57 = vadd.f32 %v1205_v46, %v1137_v42  ;;  %v1406_v56 = vmul.f32 %v2739_v41, %v3082_v47  ;;  %v3128_v42 = vld [vmem:[#allocation2 + $0xc8] sm:$0xff] }
 0x129   : > { %v1506_v10 = vmul.f32 %v2736_v35, %v3084_v55  ;;  %v708_v63 = vmin.f32 %v676_v61, 6.0  ;;  %v1038_v0 = vadd.f32 %v1006_v4, %v938_v48  ;;  %v1206_v62 = vmul.f32 %v3053_v12, %v2718_v14  ;;  %v3130_v46 = vld [vmem:[#allocation2 + $0xc9] sm:$0xff] }
 0x12a   : > { %v1739_v5 = vmin.f32 %v1707_v54, 6.0  ;;  %v1637_v7 = vadd.f32 %v1605_v33, %v1537_v26  ;;  %v1337_v6 = vadd.f32 %v1305_v58, %v1237_v57  ;;  %v637_v9 = vadd.f32 %v2683_v37, %v636_v59 }
 0x12b   : > { %787 = vst.msk [vmem:[#allocation2 + $0x189] sm:$0xff] %vm709_vm2, %v708_v63  ;;  %v1138_v11 = vadd.f32 %v1106_v40, %v1038_v0  ;;  %v839_v15 = vmul.f32 %v3022_v36, %v2694_v44  ;;  %v907_v16 = vmul.f32 %v3024_v38, %v2697_v45  ;;  %v1306_v1 = vmul.f32 %v3064_v28, %v2724_v20 }
 0x12c   : > { %2423 = vmatmul.mubr.msk.f32.gmra.mxu1 %vm709_vm2, %v1739_v5  ;;  %v1676_v13 = vadd.f32 %v2805_v53, %v1637_v7  ;;  %v1438_v19 = vadd.f32 %v1406_v56, %v1337_v6  ;;  %v1007_v18 = vmul.f32 %v3031_v3, %v2705_v60  ;;  %v675_v36 = vmax.f32 %v637_v9, 0.0  ;;  %v1572_v5 = vld [vmem:[#allocation2 + $0xca] sm:$0xff]  ;;  %v3149_v7 = vld [vmem:[#allocation2 + $0xd8] sm:$0xff] }
 0x12d   : > { %v1238_v37 = vadd.f32 %v1206_v62, %v1138_v11  ;;  %v939_v2 = vadd.f32 %v907_v16, %v839_v15  ;;  %v1107_v38 = vmul.f32 %v3082_v47, %v2731_v27  ;;  %v1606_v25 = vmul.f32 %v2790_v32, %v1570_v8  ;;  %v3151_v6 = vld [vmem:[#allocation2 + $0xd9] sm:$0xff] }
 0x12e   : > { %v1708_v23 = vmax.f32 %v1676_v13, 0.0  ;;  %v1538_v24 = vadd.f32 %v1506_v10, %v1438_v19  ;;  %v1407_v22 = vmul.f32 %v2739_v41, %v3108_v17  ;;  %v707_v31 = vmin.f32 %v675_v36, 6.0 }
 0x12f   : > { %v1338_v29 = vadd.f32 %v1306_v1, %v1238_v37  ;;  %v1039_v3 = vadd.f32 %v1007_v18, %v939_v2  ;;  %v1507_v52 = vmul.f32 %v2736_v35, %v3112_v21  ;;  %v840_v49 = vmul.f32 %v3051_v34, %v2694_v44  ;;  %v3161_v1 = vld [vmem:[#allocation2 + $0xda] sm:$0xff] }
 0x130   : > { %v1740_v50 = vmin.f32 %v1708_v23, 6.0  ;;  %v1638_v33 = vadd.f32 %v1606_v25, %v1538_v24  ;;  %786 = vst.msk [vmem:[#allocation2 + $0x181] sm:$0xff] %vm709_vm2, %v707_v31  ;;  %v1207_v43 = vmul.f32 %v3084_v55, %v2718_v14  ;;  %v908_v61 = vmul.f32 %v3053_v12, %v2697_v45 }
 0x131   : > { %v1439_v51 = vadd.f32 %v1407_v22, %v1338_v29  ;;  %v1139_v39 = vadd.f32 %v1107_v38, %v1039_v3  ;;  %v1607_v34 = vmul.f32 %v2790_v32, %v3119_v30  ;;  %v1307_v4 = vmul.f32 %v1570_v8, %v2724_v20  ;;  %v3175_v22 = vld [vmem:[#allocation2 + $0xe0] sm:$0xff] }
 0x132   : > { %2425 = vmatprep.mubr.msk.f32.mxu1 %vm709_vm2, %v1740_v50  ;;  %v1677_v48 = vadd.f32 %v2805_v53, %v1638_v33  ;;  %v1008_v40 = vmul.f32 %v3064_v28, %v2705_v60  ;;  %v940_v57 = vadd.f32 %v908_v61, %v840_v49  ;;  %v1108_v58 = vmul.f32 %v3108_v17, %v2731_v27 }
 0x133   : > { %v1539_v54 = vadd.f32 %v1507_v52, %v1439_v51  ;;  %v1239_v26 = vadd.f32 %v1207_v43, %v1139_v39  ;;  %v1408_v12 = vmul.f32 %v2739_v41, %v3128_v42  ;;  %v1508_v56 = vmul.f32 %v2736_v35, %v3130_v46  ;;  %v3181_v51 = vld [vmem:[#allocation2 + $0xe1] sm:$0xff] }
 0x134   : > { %v1709_v59 = vmax.f32 %v1677_v48, 0.0  ;;  %v841_v10 = vmul.f32 %v3082_v47, %v2694_v44  ;;  %v1040_v28 = vadd.f32 %v1008_v40, %v940_v57  ;;  %v909_v62 = vmul.f32 %v3084_v55, %v2697_v45 }
 0x135   : > { %v1639_v63 = vadd.f32 %v1607_v34, %v1539_v54  ;;  %v1339_v0 = vadd.f32 %v1307_v4, %v1239_v26  ;;  %v1208_v9 = vmul.f32 %v3112_v21, %v2718_v14  ;;  %v1009_v15 = vmul.f32 %v1570_v8, %v2705_v60  ;;  %v3194_v54 = vld [vmem:[#allocation2 + $0xe2] sm:$0xff] }
 0x136   : > { %v1741_v11 = vmin.f32 %v1709_v59, 6.0  ;;  %v1109_v47 = vmul.f32 %v3128_v42, %v2731_v27  ;;  %v1140_v19 = vadd.f32 %v1108_v58, %v1040_v28  ;;  %v941_v18 = vadd.f32 %v909_v62, %v841_v10  ;;  %v3202_v10 = vld [vmem:[#allocation2 + $0xf0] sm:$0xff] }
 0x137   : > { %v1678_v16 = vadd.f32 %v2805_v53, %v1639_v63  ;;  %v1440_v13 = vadd.f32 %v1408_v12, %v1339_v0  ;;  %v1608_v55 = vmul.f32 %v2790_v32, %v1572_v5  ;;  %v1308_v37 = vmul.f32 %v3119_v30, %v2724_v20  ;;  %v3204_v0 = vld [vmem:[#allocation2 + $0xf1] sm:$0xff] }
 0x138   : > { %2426 = vmatmul.mubr.msk.f32.gmra.mxu1 %vm709_vm2, %v1741_v11  ;;  %v1409_v8 = vmul.f32 %v2739_v41, %v3149_v7  ;;  %v1509_v36 = vmul.f32 %v2736_v35, %v3151_v6  ;;  %v1240_v23 = vadd.f32 %v1208_v9, %v1140_v19  ;;  %v1041_v24 = vadd.f32 %v1009_v15, %v941_v18 }
 0x139   : > { %v1710_v2 = vmax.f32 %v1678_v16, 0.0  ;;  %v1540_v38 = vadd.f32 %v1508_v56, %v1440_v13  ;;  %v1609_v25 = vmul.f32 %v2790_v32, %v3161_v1  ;;  %v1209_v29 = vmul.f32 %v3130_v46, %v2718_v14 }
 0x13a   : > { %v842_v31 = vmul.f32 %v3108_v17, %v2694_v44  ;;  %v910_v3 = vmul.f32 %v3112_v21, %v2697_v45  ;;  %v1340_v52 = vadd.f32 %v1308_v37, %v1240_v23  ;;  %v1141_v49 = vadd.f32 %v1109_v47, %v1041_v24  ;;  %v3223_v23 = vld [vmem:[#allocation2 + $0xf8] sm:$0xff] }
 0x13b   : > { %v1742_v50 = vmin.f32 %v1710_v2, 6.0  ;;  %v1640_v33 = vadd.f32 %v1608_v55, %v1540_v38  ;;  %v1309_v39 = vmul.f32 %v1572_v5, %v2724_v20  ;;  %v1010_v61 = vmul.f32 %v3119_v30, %v2705_v60 }
 0x13c   : > { %v942_v43 = vadd.f32 %v910_v3, %v842_v31  ;;  %v1110_v48 = vmul.f32 %v3149_v7, %v2731_v27  ;;  %v1441_v21 = vadd.f32 %v1409_v8, %v1340_v52  ;;  %v1241_v34 = vadd.f32 %v1209_v29, %v1141_v49  ;;  %v3229_v3 = vld [vmem:[#allocation2 + $0xf9] sm:$0xff] }
 0x13d   : > { %2428 = vmatprep.mubr.msk.f32.mxu1 %vm709_vm2, %v1742_v50  ;;  %v1679_v17 = vadd.f32 %v2805_v53, %v1640_v33  ;;  %v1410_v4 = vmul.f32 %v2739_v41, %v3175_v22  ;;  %v1510_v40 = vmul.f32 %v2736_v35, %v3181_v51  ;;  %v843_v30 = vmul.f32 %v3128_v42, %v2694_v44  ;;  %v3233_v52 = vld [vmem:[#allocation2 + $0xfa] sm:$0xff] }
 0x13e   : > { %v1042_v26 = vadd.f32 %v1010_v61, %v942_v43  ;;  %v911_v57 = vmul.f32 %v3130_v46, %v2697_v45  ;;  %v1541_v59 = vadd.f32 %v1509_v36, %v1441_v21  ;;  %v1341_v12 = vadd.f32 %v1309_v39, %v1241_v34  ;;  %v1575_v36 = vld [vmem:[#allocation2 + $0xf2] sm:$0xff] }
 0x13f   : > { %v1711_v58 = vmax.f32 %v1679_v17, 0.0  ;;  %v1210_v56 = vmul.f32 %v3151_v6, %v2718_v14  ;;  %v1011_v62 = vmul.f32 %v1572_v5, %v2705_v60  ;;  %v1111_v42 = vmul.f32 %v3175_v22, %v2731_v27 }
 0x140   : > { %v1142_v63 = vadd.f32 %v1110_v48, %v1042_v26  ;;  %v943_v28 = vadd.f32 %v911_v57, %v843_v30  ;;  %v1641_v9 = vadd.f32 %v1609_v25, %v1541_v59  ;;  %v1442_v46 = vadd.f32 %v1410_v4, %v1341_v12 }
 0x141   : > { %v1743_v11 = vmin.f32 %v1711_v58, 6.0  ;;  %v1610_v15 = vmul.f32 %v2790_v32, %v3194_v54  ;;  %v1310_v16 = vmul.f32 %v3161_v1, %v2724_v20  ;;  %v1411_v13 = vmul.f32 %v2739_v41, %v3202_v10 }
 0x142   : > { %v1242_v47 = vadd.f32 %v1210_v56, %v1142_v63  ;;  %v1043_v19 = vadd.f32 %v1011_v62, %v943_v28  ;;  %v1680_v5 = vadd.f32 %v2805_v53, %v1641_v9  ;;  %v1542_v18 = vadd.f32 %v1510_v40, %v1442_v46  ;;  %v3252_v56 = vld [vmem:[#allocation2 + $0x108] sm:$0xff] }
 0x143   : > { %2429 = vmatmul.mubr.msk.f32.gmra.mxu1 %vm709_vm2, %v1743_v11  ;;  %v1511_v55 = vmul.f32 %v2736_v35, %v3204_v0  ;;  %v844_v37 = vmul.f32 %v3149_v7, %v2694_v44  ;;  %v1211_v38 = vmul.f32 %v3181_v51, %v2718_v14  ;;  %v912_v24 = vmul.f32 %v3151_v6, %v2697_v45  ;;  %v3254_v63 = vld [vmem:[#allocation2 + $0x109] sm:$0xff] }
 0x144   : > { %v1342_v8 = vadd.f32 %v1310_v16, %v1242_v47  ;;  %v1143_v2 = vadd.f32 %v1111_v42, %v1043_v19  ;;  %v1712_v25 = vmax.f32 %v1680_v5, 0.0  ;;  %v1642_v29 = vadd.f32 %v1610_v15, %v1542_v18  ;;  %v1577_v5 = vld [vmem:[#allocation2 + $0x10a] sm:$0xff] }
 0x145   : > { %v1311_v31 = vmul.f32 %v3194_v54, %v2724_v20  ;;  %v1012_v7 = vmul.f32 %v3161_v1, %v2705_v60  ;;  %v944_v49 = vadd.f32 %v912_v24, %v844_v37  ;;  %v1112_v39 = vmul.f32 %v3202_v10, %v2731_v27 }
 0x146   : > { %v1443_v50 = vadd.f32 %v1411_v13, %v1342_v8  ;;  %v1243_v33 = vadd.f32 %v1211_v38, %v1143_v2  ;;  %v1744_v43 = vmin.f32 %v1712_v25, 6.0  ;;  %v1681_v6 = vadd.f32 %v2805_v53, %v1642_v29  ;;  %v3273_v8 = vld [vmem:[#allocation2 + $0x110] sm:$0xff] }
 0x147   : > { %v1611_v61 = vmul.f32 %v2790_v32, %v1575_v36  ;;  %v1412_v48 = vmul.f32 %v2739_v41, %v3223_v23  ;;  %v1512_v1 = vmul.f32 %v2736_v35, %v3229_v3  ;;  %v1044_v34 = vadd.f32 %v1012_v7, %v944_v49  ;;  %v3279_v29 = vld [vmem:[#allocation2 + $0x111] sm:$0xff] }
 0x148   : > { %v1543_v17 = vadd.f32 %v1511_v55, %v1443_v50  ;;  %v1343_v21 = vadd.f32 %v1311_v31, %v1243_v33  ;;  %2431 = vmatprep.mubr.msk.f32.mxu1 %vm709_vm2, %v1744_v43  ;;  %v1713_v4 = vmax.f32 %v1681_v6, 0.0  ;;  %v1612_v40 = vmul.f32 %v2790_v32, %v3233_v52 }
 0x149   : > { %v845_v26 = vmul.f32 %v3175_v22, %v2694_v44  ;;  %v913_v30 = vmul.f32 %v3181_v51, %v2697_v45  ;;  %v1144_v59 = vadd.f32 %v1112_v39, %v1044_v34  ;;  %v1212_v12 = vmul.f32 %v3204_v0, %v2718_v14 }
 0x14a   : > { %v1643_v57 = vadd.f32 %v1611_v61, %v1543_v17  ;;  %v1444_v58 = vadd.f32 %v1412_v48, %v1343_v21  ;;  %v1745_v28 = vmin.f32 %v1713_v4, 6.0  ;;  %v1013_v32 = vmul.f32 %v3194_v54, %v2705_v60  ;;  %v1578_v61 = vld [vmem:[#allocation2 + $0x112] sm:$0xff] }
 0x14b   : > { %v945_v62 = vadd.f32 %v913_v30, %v845_v26  ;;  %v1113_v22 = vmul.f32 %v3223_v23, %v2731_v27  ;;  %v1244_v11 = vadd.f32 %v1212_v12, %v1144_v59  ;;  %v1312_v9 = vmul.f32 %v1575_v36, %v2724_v20  ;;  %v3302_v30 = vld [vmem:[#allocation2 + $0x121] sm:$0xff] }
 0x14c   : > { %v1682_v51 = vadd.f32 %v2805_v53, %v1643_v57  ;;  %v1544_v42 = vadd.f32 %v1512_v1, %v1444_v58  ;;  %2432 = vmatmul.mubr.msk.f32.gmra.mxu1 %vm709_vm2, %v1745_v28  ;;  %v1413_v46 = vmul.f32 %v2739_v41, %v3252_v56  ;;  %v1513_v15 = vmul.f32 %v2736_v35, %v3254_v63 }
 0x14d   : > { %v1045_v47 = vadd.f32 %v1013_v32, %v945_v62  ;;  %v846_v54 = vmul.f32 %v3202_v10, %v2694_v44  ;;  %v1344_v19 = vadd.f32 %v1312_v9, %v1244_v11  ;;  %v914_v18 = vmul.f32 %v3204_v0, %v2697_v45  ;;  %v3284_v0 = vld [vmem:[%s3669_s3 + $0x8] ss:$0 sm:$0xff] }
 0x14e   : > { %v1714_v16 = vmax.f32 %v1682_v51, 0.0  ;;  %v1644_v13 = vadd.f32 %v1612_v40, %v1544_v42  ;;  %v1213_v37 = vmul.f32 %v3229_v3, %v2718_v14  ;;  %v1014_v2 = vmul.f32 %v1575_v36, %v2705_v60  ;;  %v3300_v40 = vld [vmem:[#allocation2 + $0x120] sm:$0xff] }
 0x14f   : > { %v1145_v55 = vadd.f32 %v1113_v22, %v1045_v47  ;;  %v1114_v38 = vmul.f32 %v3252_v56, %v2731_v27  ;;  %v1445_v25 = vadd.f32 %v1413_v46, %v1344_v19  ;;  %v946_v31 = vadd.f32 %v914_v18, %v846_v54  ;;  %v1579_v46 = vld [vmem:[#allocation2 + $0x122] sm:$0xff] }
 0x150   : > { %v1746_v24 = vmin.f32 %v1714_v16, 6.0  ;;  %v1683_v10 = vadd.f32 %v2805_v53, %v1644_v13  ;;  %v1613_v7 = vmul.f32 %v3284_v0, %v1577_v5  ;;  %v1313_v36 = vmul.f32 %v3233_v52, %v2724_v20  ;;  %v3327_v13 = vld [vmem:[#allocation2 + $0x128] sm:$0xff] }
 0x151   : > { %v1245_v50 = vadd.f32 %v1213_v37, %v1145_v55  ;;  %v1545_v49 = vadd.f32 %v1513_v15, %v1445_v25  ;;  %v1414_v53 = vmul.f32 %v2739_v41, %v3273_v8  ;;  %v1046_v39 = vadd.f32 %v1014_v2, %v946_v31  ;;  %v3330_v55 = vld [vmem:[#allocation2 + $0x129] sm:$0xff] }
 0x152   : > { %2434 = vmatprep.mubr.msk.f32.mxu1 %vm709_vm2, %v1746_v24  ;;  %v1715_v33 = vmax.f32 %v1683_v10, 0.0  ;;  %v1514_v6 = vmul.f32 %v2736_v35, %v3279_v29  ;;  %v847_v48 = vmul.f32 %v3223_v23, %v2694_v44  ;;  %v915_v17 = vmul.f32 %v3229_v3, %v2697_v45  ;;  %v3312_v3 = vld [vmem:[%s3670_s4] ss:$0 sm:$0xff] }
 0x153   : > { %v1345_v43 = vadd.f32 %v1313_v36, %v1245_v50  ;;  %v1645_v1 = vadd.f32 %v1613_v7, %v1545_v49  ;;  %v1146_v34 = vadd.f32 %v1114_v38, %v1046_v39  ;;  %v1214_v4 = vmul.f32 %v3254_v63, %v2718_v14  ;;  %v1580_v49 = vld [vmem:[#allocation2 + $0x12a] sm:$0xff] }
 0x154   : > { %v1747_v21 = vmin.f32 %v1715_v33, 6.0  ;;  %v947_v57 = vadd.f32 %v915_v17, %v847_v48  ;;  %v1015_v58 = vmul.f32 %v3233_v52, %v2705_v60  ;;  %v1115_v23 = vmul.f32 %v3273_v8, %v2731_v27  ;;  %v3348_v48 = vld [vmem:[#allocation2 + $0x138] sm:$0xff] }
 0x155   : > { %v1446_v26 = vadd.f32 %v1414_v53, %v1345_v43  ;;  %v1684_v59 = vadd.f32 %v3312_v3, %v1645_v1  ;;  %v1614_v12 = vmul.f32 %v3284_v0, %v1578_v61  ;;  %v1246_v28 = vadd.f32 %v1214_v4, %v1146_v34  ;;  %v3351_v1 = vld [vmem:[#allocation2 + $0x139] sm:$0xff] }
 0x156   : > { %2435 = vmatmul.mubr.msk.f32.gmra.mxu1 %vm709_vm2, %v1747_v21  ;;  %v1314_v62 = vmul.f32 %v1577_v5, %v2724_v20  ;;  %v1415_v52 = vmul.f32 %v2739_v41, %v3300_v40  ;;  %v1047_v22 = vadd.f32 %v1015_v58, %v947_v57  ;;  %v848_v51 = vmul.f32 %v3252_v56, %v2694_v44 }
 0x157   : > { %v1546_v32 = vadd.f32 %v1514_v6, %v1446_v26  ;;  %v1716_v42 = vmax.f32 %v1684_v59, 0.0  ;;  %v1515_v9 = vmul.f32 %v2736_v35, %v3302_v30  ;;  %v916_v15 = vmul.f32 %v3254_v63, %v2697_v45 }
 0x158   : > { %v1346_v11 = vadd.f32 %v1314_v62, %v1246_v28  ;;  %v1147_v54 = vadd.f32 %v1115_v23, %v1047_v22  ;;  %v1215_v16 = vmul.f32 %v3279_v29, %v2718_v14  ;;  %v1016_v19 = vmul.f32 %v1577_v5, %v2705_v60 }
 0x159   : > { %v1646_v47 = vadd.f32 %v1614_v12, %v1546_v32  ;;  %v1748_v18 = vmin.f32 %v1716_v42, 6.0  ;;  %v948_v37 = vadd.f32 %v916_v15, %v848_v51  ;;  %v1116_v2 = vmul.f32 %v3300_v40, %v2731_v27 }
 0x15a   : > { %v1447_v56 = vadd.f32 %v1415_v52, %v1346_v11  ;;  %v1615_v63 = vmul.f32 %v3284_v0, %v1579_v46  ;;  %v1247_v24 = vadd.f32 %v1215_v16, %v1147_v54  ;;  %v1315_v10 = vmul.f32 %v1578_v61, %v2724_v20  ;;  %v1581_v52 = vld [vmem:[#allocation2 + $0x13a] sm:$0xff] }
 0x15b   : > { %v1685_v38 = vadd.f32 %v3312_v3, %v1646_v47  ;;  %2437 = vmatprep.mubr.msk.f32.mxu1 %vm709_vm2, %v1748_v18  ;;  %v1416_v5 = vmul.f32 %v2739_v41, %v3327_v13  ;;  %v1048_v31 = vadd.f32 %v1016_v19, %v948_v37  ;;  %v849_v7 = vmul.f32 %v3273_v8, %v2694_v44  ;;  %v3372_v54 = vld [vmem:[#allocation2 + $0x141] sm:$0xff] }
 0x15c   : > { %v1547_v25 = vadd.f32 %v1515_v9, %v1447_v56  ;;  %v1347_v36 = vadd.f32 %v1315_v10, %v1247_v24  ;;  %v1516_v33 = vmul.f32 %v2736_v35, %v3330_v55  ;;  %v917_v53 = vmul.f32 %v3279_v29, %v2697_v45  ;;  %v3369_v9 = vld [vmem:[#allocation2 + $0x140] sm:$0xff] }
 0x15d   : > { %v1717_v50 = vmax.f32 %v1685_v38, 0.0  ;;  %v1148_v43 = vadd.f32 %v1116_v2, %v1048_v31  ;;  %v1216_v6 = vmul.f32 %v3302_v30, %v2718_v14  ;;  %v1017_v17 = vmul.f32 %v1578_v61, %v2705_v60 }
 0x15e   : > { %v1647_v39 = vadd.f32 %v1615_v63, %v1547_v25  ;;  %v1448_v8 = vadd.f32 %v1416_v5, %v1347_v36  ;;  %v949_v34 = vadd.f32 %v917_v53, %v849_v7  ;;  %v1117_v4 = vmul.f32 %v3327_v13, %v2731_v27  ;;  %v1582_v5 = vld [vmem:[#allocation2 + $0x142] sm:$0xff] }
 0x15f   : > { %v1749_v21 = vmin.f32 %v1717_v50, 6.0  ;;  %v1616_v29 = vmul.f32 %v3284_v0, %v1580_v49  ;;  %v1248_v57 = vadd.f32 %v1216_v6, %v1148_v43  ;;  %v1316_v58 = vmul.f32 %v1579_v46, %v2724_v20  ;;  %v3393_v43 = vld [vmem:[#allocation2 + $0x151] sm:$0xff] }
 0x160   : > { %v1686_v26 = vadd.f32 %v3312_v3, %v1647_v39  ;;  %v1548_v23 = vadd.f32 %v1516_v33, %v1448_v8  ;;  %v1417_v61 = vmul.f32 %v2739_v41, %v3348_v48  ;;  %v1049_v59 = vadd.f32 %v1017_v17, %v949_v34  ;;  %v3390_v33 = vld [vmem:[#allocation2 + $0x150] sm:$0xff] }
 0x161   : > { %2438 = vmatmul.mubr.msk.f32.gmra.mxu1 %vm709_vm2, %v1749_v21  ;;  %v850_v12 = vmul.f32 %v3300_v40, %v2694_v44  ;;  %v1348_v62 = vadd.f32 %v1316_v58, %v1248_v57  ;;  %v1517_v32 = vmul.f32 %v2736_v35, %v3351_v1  ;;  %v918_v22 = vmul.f32 %v3302_v30, %v2697_v45 }
 0x162   : > { %v1718_v28 = vmax.f32 %v1686_v26, 0.0  ;;  %v1648_v51 = vadd.f32 %v1616_v29, %v1548_v23  ;;  %v1149_v42 = vadd.f32 %v1117_v4, %v1049_v59  ;;  %v1217_v11 = vmul.f32 %v3330_v55, %v2718_v14 }
 0x163   : > { %v1018_v15 = vmul.f32 %v1579_v46, %v2705_v60  ;;  %v1449_v40 = vadd.f32 %v1417_v61, %v1348_v62  ;;  %v950_v16 = vadd.f32 %v918_v22, %v850_v12  ;;  %v1118_v19 = vmul.f32 %v3348_v48, %v2731_v27  ;;  %v1583_v61 = vld [vmem:[#allocation2 + $0x152] sm:$0xff] }
 0x164   : > { %v1750_v47 = vmin.f32 %v1718_v28, 6.0  ;;  %v1687_v18 = vadd.f32 %v3312_v3, %v1648_v51  ;;  %v1617_v30 = vmul.f32 %v3284_v0, %v1581_v52  ;;  %v1249_v56 = vadd.f32 %v1217_v11, %v1149_v42  ;;  %v3414_v42 = vld [vmem:[#allocation2 + $0x159] sm:$0xff] }
 0x165   : > { %v1317_v37 = vmul.f32 %v1580_v49, %v2724_v20  ;;  %v1549_v2 = vadd.f32 %v1517_v32, %v1449_v40  ;;  %v1418_v46 = vmul.f32 %v2739_v41, %v3369_v9  ;;  %v1050_v38 = vadd.f32 %v1018_v15, %v950_v16  ;;  %v3411_v32 = vld [vmem:[#allocation2 + $0x158] sm:$0xff] }
 0x166   : > { %2440 = vmatprep.mubr.msk.f32.mxu1 %vm709_vm2, %v1750_v47  ;;  %v851_v63 = vmul.f32 %v3327_v13, %v2694_v44  ;;  %v1719_v24 = vmax.f32 %v1687_v18, 0.0  ;;  %v1518_v25 = vmul.f32 %v2736_v35, %v3372_v54  ;;  %v919_v31 = vmul.f32 %v3330_v55, %v2697_v45 }
 0x167   : > { %v1349_v10 = vadd.f32 %v1317_v37, %v1249_v56  ;;  %v1649_v7 = vadd.f32 %v1617_v30, %v1549_v2  ;;  %v1150_v50 = vadd.f32 %v1118_v19, %v1050_v38  ;;  %v1218_v36 = vmul.f32 %v3351_v1, %v2718_v14 }
 0x168   : > { %v1019_v53 = vmul.f32 %v1580_v49, %v2705_v60  ;;  %v1751_v39 = vmin.f32 %v1719_v24, 6.0  ;;  %v951_v6 = vadd.f32 %v919_v31, %v851_v63  ;;  %v1119_v17 = vmul.f32 %v3369_v9, %v2731_v27 }
 0x169   : > { %v1450_v13 = vadd.f32 %v1418_v46, %v1349_v10  ;;  %v1688_v21 = vadd.f32 %v3312_v3, %v1649_v7  ;;  %v1618_v55 = vmul.f32 %v3284_v0, %v1582_v5  ;;  %v1250_v8 = vadd.f32 %v1218_v36, %v1150_v50  ;;  %v1584_v46 = vld [vmem:[#allocation2 + $0x15a] sm:$0xff]  ;;  %v3435_v50 = vld [vmem:[#allocation2 + $0x169] sm:$0xff] }
 0x16a   : > { %v1318_v34 = vmul.f32 %v1581_v52, %v2724_v20  ;;  %2441 = vmatmul.mubr.msk.f32.gmra.mxu1 %vm709_vm2, %v1751_v39  ;;  %v1419_v49 = vmul.f32 %v2739_v41, %v3390_v33  ;;  %v1051_v26 = vadd.f32 %v1019_v53, %v951_v6  ;;  %v852_v29 = vmul.f32 %v3348_v48, %v2694_v44 }
 0x16b   : > { %v1550_v4 = vadd.f32 %v1518_v25, %v1450_v13  ;;  %v1720_v57 = vmax.f32 %v1688_v21, 0.0  ;;  %v1519_v23 = vmul.f32 %v2736_v35, %v3393_v43  ;;  %v920_v59 = vmul.f32 %v3351_v1, %v2697_v45  ;;  %v3432_v25 = vld [vmem:[#allocation2 + $0x168] sm:$0xff] }
 0x16c   : > { %v1350_v58 = vadd.f32 %v1318_v34, %v1250_v8  ;;  %v1151_v28 = vadd.f32 %v1119_v17, %v1051_v26  ;;  %v1219_v62 = vmul.f32 %v3372_v54, %v2718_v14  ;;  %v1020_v22 = vmul.f32 %v1581_v52, %v2705_v60 }
 0x16d   : > { %v1650_v12 = vadd.f32 %v1618_v55, %v1550_v4  ;;  %v1752_v51 = vmin.f32 %v1720_v57, 6.0  ;;  %v952_v11 = vadd.f32 %v920_v59, %v852_v29  ;;  %v1120_v15 = vmul.f32 %v3390_v33, %v2731_v27 }
 0x16e   : > { %v1451_v48 = vadd.f32 %v1419_v49, %v1350_v58  ;;  %v1619_v1 = vmul.f32 %v3284_v0, %v1583_v61  ;;  %v1251_v40 = vadd.f32 %v1219_v62, %v1151_v28  ;;  %v1319_v16 = vmul.f32 %v1582_v5, %v2724_v20  ;;  %v1585_v49 = vld [vmem:[#allocation2 + $0x16a] sm:$0xff] }
 0x16f   : > { %v1689_v47 = vadd.f32 %v3312_v3, %v1650_v12  ;;  %2443 = vmatprep.mubr.msk.f32.mxu1 %vm709_vm2, %v1752_v51  ;;  %v1420_v52 = vmul.f32 %v2739_v41, %v3411_v32  ;;  %v1052_v18 = vadd.f32 %v1020_v22, %v952_v11  ;;  %v853_v30 = vmul.f32 %v3369_v9, %v2694_v44  ;;  %v3456_v28 = vld [vmem:[#allocation2 + $0x171] sm:$0xff] }
 0x170   : > { %v1551_v19 = vadd.f32 %v1519_v23, %v1451_v48  ;;  %v1351_v37 = vadd.f32 %v1319_v16, %v1251_v40  ;;  %v1520_v2 = vmul.f32 %v2736_v35, %v3414_v42  ;;  %v921_v38 = vmul.f32 %v3372_v54, %v2697_v45  ;;  %v3453_v23 = vld [vmem:[#allocation2 + $0x170] sm:$0xff] }
 0x171   : > { %v1721_v56 = vmax.f32 %v1689_v47, 0.0  ;;  %v1152_v24 = vadd.f32 %v1120_v15, %v1052_v18  ;;  %v1220_v10 = vmul.f32 %v3393_v43, %v2718_v14  ;;  %v1021_v31 = vmul.f32 %v1582_v5, %v2705_v60 }
 0x172   : > { %v1651_v63 = vadd.f32 %v1619_v1, %v1551_v19  ;;  %v1452_v9 = vadd.f32 %v1420_v52, %v1351_v37  ;;  %v953_v36 = vadd.f32 %v921_v38, %v853_v30  ;;  %v1121_v53 = vmul.f32 %v3411_v32, %v2731_v27  ;;  %v1586_v52 = vld [vmem:[#allocation2 + $0x172] sm:$0xff] }
 0x173   : > { %v1753_v7 = vmin.f32 %v1721_v56, 6.0  ;;  %v1620_v54 = vmul.f32 %v3284_v0, %v1584_v46  ;;  %v1252_v13 = vadd.f32 %v1220_v10, %v1152_v24  ;;  %v1320_v6 = vmul.f32 %v1583_v61, %v2724_v20 }
 0x174   : > { %v1690_v39 = vadd.f32 %v3312_v3, %v1651_v63  ;;  %v1552_v17 = vadd.f32 %v1520_v2, %v1452_v9  ;;  %v1421_v5 = vmul.f32 %v2739_v41, %v3432_v25  ;;  %v1053_v21 = vadd.f32 %v1021_v31, %v953_v36  ;;  %v1387_v2 = vld [vmem:[#allocation2 + $0x180] sm:$0xff] }
 0x175   : > { %2444 = vmatmul.mubr.msk.f32.gmra.mxu1 %vm709_vm2, %v1753_v7  ;;  %v854_v55 = vmul.f32 %v3390_v33, %v2694_v44  ;;  %v1352_v34 = vadd.f32 %v1320_v6, %v1252_v13  ;;  %v1521_v4 = vmul.f32 %v2736_v35, %v3435_v50  ;;  %v922_v26 = vmul.f32 %v3393_v43, %v2697_v45 }
 0x176   : > { %v1722_v8 = vmax.f32 %v1690_v39, 0.0  ;;  %v1652_v29 = vadd.f32 %v1620_v54, %v1552_v17  ;;  %v1153_v57 = vadd.f32 %v1121_v53, %v1053_v21  ;;  %v1221_v58 = vmul.f32 %v3414_v42, %v2718_v14 }
 0x177   : > { %v1022_v59 = vmul.f32 %v1583_v61, %v2705_v60  ;;  %v1453_v33 = vadd.f32 %v1421_v5, %v1352_v34  ;;  %v954_v62 = vadd.f32 %v922_v26, %v854_v55  ;;  %v1122_v22 = vmul.f32 %v3432_v25, %v2731_v27  ;;  %v1587_v5 = vld [vmem:[#allocation2 + $0x182] sm:$0xff] }
 0x178   : > { %v1754_v12 = vmin.f32 %v1722_v8, 6.0  ;;  %v1691_v51 = vadd.f32 %v3312_v3, %v1652_v29  ;;  %v1621_v43 = vmul.f32 %v3284_v0, %v1585_v49  ;;  %v1253_v48 = vadd.f32 %v1221_v58, %v1153_v57  ;;  %v1488_v58 = vld [vmem:[#allocation2 + $0x189] sm:$0xff] }
 0x179   : > { %v1321_v11 = vmul.f32 %v1584_v46, %v2724_v20  ;;  %v1553_v15 = vadd.f32 %v1521_v4, %v1453_v33  ;;  %v1422_v61 = vmul.f32 %v2739_v41, %v3453_v23  ;;  %v1054_v47 = vadd.f32 %v1022_v59, %v954_v62  ;;  %v1388_v4 = vld [vmem:[#allocation2 + $0x188] sm:$0xff] }
 0x17a   : > { %2446 = vmatprep.mubr.msk.f32.mxu1 %vm709_vm2, %v1754_v12  ;;  %v855_v1 = vmul.f32 %v3411_v32, %v2694_v44  ;;  %v1723_v40 = vmax.f32 %v1691_v51, 0.0  ;;  %v1522_v19 = vmul.f32 %v2736_v35, %v3456_v28  ;;  %v923_v18 = vmul.f32 %v3414_v42, %v2697_v45  ;;  %v1487_v32 = vld [vmem:[#allocation2 + $0x181] sm:$0xff] }
 0x17b   : > { %v1353_v16 = vadd.f32 %v1321_v11, %v1253_v48  ;;  %v1653_v30 = vadd.f32 %v1621_v43, %v1553_v15  ;;  %v1154_v56 = vadd.f32 %v1122_v22, %v1054_v47  ;;  %v1222_v37 = vmul.f32 %v3435_v50, %v2718_v14 }
 0x17c   : > { %v1023_v38 = vmul.f32 %v1584_v46, %v2705_v60  ;;  %v1755_v63 = vmin.f32 %v1723_v40, 6.0  ;;  %v955_v10 = vadd.f32 %v923_v18, %v855_v1  ;;  %v1123_v31 = vmul.f32 %v3453_v23, %v2731_v27  ;;  %v1588_v40 = vld [vmem:[#allocation2 + $0x18a] sm:$0xff] }
 0x17d   : > { %v1454_v24 = vadd.f32 %v1422_v61, %v1353_v16  ;;  %v1692_v7 = vadd.f32 %v3312_v3, %v1653_v30  ;;  %v1622_v9 = vmul.f32 %v3284_v0, %v1586_v52  ;;  %v1254_v42 = vadd.f32 %v1222_v37, %v1154_v56  ;;  %v1389_v61 = vld [vmem:[#allocation2 + $0x198] sm:$0xff] }
 0x17e   : > { %v1322_v36 = vmul.f32 %v1585_v49, %v2724_v20  ;;  %2447 = vmatmul.mubr.msk.f32.gmra.mxu1 %vm709_vm2, %v1755_v63  ;;  %v1423_v39 = vmul.f32 %v2739_v41, %v1387_v2  ;;  %v1055_v46 = vadd.f32 %v1023_v38, %v955_v10  ;;  %v856_v54 = vmul.f32 %v3432_v25, %v2694_v44  ;;  %v1489_v37 = vld [vmem:[#allocation2 + $0x199] sm:$0xff] }
 0x17f   : > { %v1554_v53 = vadd.f32 %v1522_v19, %v1454_v24  ;;  %v1724_v13 = vmax.f32 %v1692_v7, 0.0  ;;  %v1523_v17 = vmul.f32 %v2736_v35, %v1487_v32  ;;  %v924_v21 = vmul.f32 %v3435_v50, %v2697_v45  ;;  %v1390_v7 = vld [vmem:[#allocation2 + $0x1a0] sm:$0xff] }
 0x180   : > { %v1354_v6 = vadd.f32 %v1322_v36, %v1254_v42  ;;  %v1155_v8 = vadd.f32 %v1123_v31, %v1055_v46  ;;  %v1223_v34 = vmul.f32 %v3456_v28, %v2718_v14  ;;  %v1024_v26 = vmul.f32 %v1585_v49, %v2705_v60  ;;  %v1490_v46 = vld [vmem:[#allocation2 + $0x1a1] sm:$0xff] }
 0x181   : > { %v1654_v55 = vadd.f32 %v1622_v9, %v1554_v53  ;;  %v1756_v29 = vmin.f32 %v1724_v13, 6.0  ;;  %v956_v25 = vadd.f32 %v924_v21, %v856_v54  ;;  %v1124_v59 = vmul.f32 %v1387_v2, %v2731_v27  ;;  %v1590_v21 = vld [vmem:[#allocation2 + $0x1a2] sm:$0xff] }
 0x182   : > { %v1455_v57 = vadd.f32 %v1423_v39, %v1354_v6  ;;  %v1623_v33 = vmul.f32 %v3284_v0, %v1587_v5  ;;  %v1255_v62 = vadd.f32 %v1223_v34, %v1155_v8  ;;  %v1323_v50 = vmul.f32 %v1586_v52, %v2724_v20 }
 0x183   : > { %v1693_v12 = vadd.f32 %v3312_v3, %v1654_v55  ;;  %2449 = vmatprep.mubr.msk.f32.mxu1 %vm709_vm2, %v1756_v29  ;;  %v1424_v51 = vmul.f32 %v2739_v41, %v1388_v4  ;;  %v1056_v43 = vadd.f32 %v1024_v26, %v956_v25  ;;  %v857_v49 = vmul.f32 %v3453_v23, %v2694_v44 }
 0x184   : > { %v1555_v22 = vadd.f32 %v1523_v17, %v1455_v57  ;;  %v1355_v11 = vadd.f32 %v1323_v50, %v1255_v62  ;;  %v1524_v15 = vmul.f32 %v2736_v35, %v1488_v58  ;;  %v925_v47 = vmul.f32 %v3456_v28, %v2697_v45  ;;  %v2469_v50 = vld [vmem:[%s2569_s8 + $0x8] sm:$0xff] }
 0x185   : > { %v1725_v48 = vmax.f32 %v1693_v12, 0.0  ;;  %v1156_v16 = vadd.f32 %v1124_v59, %v1056_v43  ;;  %v1224_v19 = vmul.f32 %v1487_v32, %v2718_v14  ;;  %v1025_v18 = vmul.f32 %v1586_v52, %v2705_v60  ;;  %v1589_v32 = vld [vmem:[#allocation2 + $0x19a] sm:$0xff] }
 0x186   : > { %v1655_v1 = vadd.f32 %v1623_v33, %v1555_v22  ;;  %v1456_v56 = vadd.f32 %v1424_v51, %v1355_v11  ;;  %v957_v2 = vadd.f32 %v925_v47, %v857_v49  ;;  %v1125_v44 = vmul.f32 %v1388_v4, %v2731_v27  ;;  %v2470_v43 = vld [vmem:[%s2569_s8] sm:$0xff] }
 0x187   : > { %v1757_v30 = vmin.f32 %v1725_v48, 6.0  ;;  %v1256_v38 = vadd.f32 %v1224_v19, %v1156_v16  ;;  %v1324_v63 = vmul.f32 %v1587_v5, %v2724_v20  ;;  %v1425_v45 = vmul.f32 %v2739_v41, %v1389_v61  ;;  %v2471_v61 = vld [vmem:[%s2569_s8 + $0x18] sm:$0xff] }
 0x188   : > { %v1694_v23 = vadd.f32 %v3312_v3, %v1655_v1  ;;  %v1556_v28 = vadd.f32 %v1524_v15, %v1456_v56  ;;  %v1624_v24 = vmul.f32 %v3284_v0, %v1588_v40  ;;  %v1057_v60 = vadd.f32 %v1025_v18, %v957_v2  ;;  %v2473_v56 = vld [vmem:[%s2569_s8 + $0x28] sm:$0xff] }
 0x189   : > { %2450 = vmatmul.mubr.msk.f32.gmra.mxu1 %vm709_vm2, %v1757_v30  ;;  %v1356_v10 = vadd.f32 %v1324_v63, %v1256_v38  ;;  %v1525_v31 = vmul.f32 %v2736_v35, %v1489_v37  ;;  %v1225_v42 = vmul.f32 %v1488_v58, %v2718_v14  ;;  %v1625_v39 = vmul.f32 %v3284_v0, %v1589_v32 }
 0x18a   : > { %v1726_v52 = vmax.f32 %v1694_v23, 0.0  ;;  %v1656_v27 = vadd.f32 %v1624_v24, %v1556_v28  ;;  %v1157_v9 = vadd.f32 %v1125_v44, %v1057_v60  ;;  %v1325_v6 = vmul.f32 %v1588_v40, %v2724_v20  ;;  %v2472_v40 = vld [vmem:[%s2569_s8 + $0x10] sm:$0xff]  ;;  %v2474_v44 = vld [vmem:[%s2569_s8 + $0x20] sm:$0xff]  ;;  %v2475_v28 = vld [vmem:[%s2569_s8 + $0x38] sm:$0xff] }
 0x18b   : > { %v1457_v53 = vadd.f32 %v1425_v45, %v1356_v10  ;;  %v1426_v17 = vmul.f32 %v2739_v41, %v1390_v7  ;;  %v1526_v14 = vmul.f32 %v2736_v35, %v1490_v46  ;;  %v1626_v29 = vmul.f32 %v3284_v0, %v1590_v21  ;;  %v3526_v0 = vld [vmem:[%s3672_s6] ss:$0 sm:$0xff]  ;;  %v2476_v60 = vld [vmem:[%s2569_s8 + $0x30] sm:$0xff] }
 0x18c   : > { %v1758_v36 = vmin.f32 %v1726_v52, 6.0  ;;  %v1695_v54 = vadd.f32 %v3312_v3, %v1656_v27  ;;  %v1257_v13 = vadd.f32 %v1225_v42, %v1157_v9  ;;  %v2477_v27 = vld [vmem:[%s2569_s8 + $0x48] sm:$0xff] }
 0x18d   : > { %v1557_v5 = vadd.f32 %v1525_v31, %v1457_v53 }
 0x18e   : > { %2452 = vmatprep.mubr.msk.f32.mxu1 %vm709_vm2, %v1758_v36  ;;  %v1727_v55 = vmax.f32 %v1695_v54, 0.0  ;;  %v1357_v8 = vadd.f32 %v1325_v6, %v1257_v13  ;;  %v2478_v36 = vld [vmem:[%s2569_s8 + $0x40] sm:$0xff]  ;;  %v2479_v13 = vld [vmem:[%s2569_s8 + $0x58] sm:$0xff] }
 0x18f   : > { %v1657_v34 = vadd.f32 %v1625_v39, %v1557_v5  ;;  %v2480_v5 = vld [vmem:[%s2569_s8 + $0x50] sm:$0xff] }
 0x190   : > { %v1759_v4 = vmin.f32 %v1727_v55, 6.0  ;;  %v1458_v26 = vadd.f32 %v1426_v17, %v1357_v8 }
 0x191   : > { %v1696_v57 = vadd.f32 %v3312_v3, %v1657_v34  ;;  %v2481_v34 = vld [vmem:[%s2569_s8 + $0x68] sm:$0xff] }
 0x192   : > { %2453 = vmatmul.mubr.msk.f32.gmra.mxu1 %vm709_vm2, %v1759_v4  ;;  %v1558_v20 = vadd.f32 %v1526_v14, %v1458_v26 }
 0x193   : > { %v1728_v41 = vmax.f32 %v1696_v57, 0.0 }
 0x194   : > { %v1658_v58 = vadd.f32 %v1626_v29, %v1558_v20  ;;  %v2482_v29 = vld [vmem:[%s2569_s8 + $0x60] sm:$0xff] }
 0x195   : > { %v1760_v25 = vmin.f32 %v1728_v41, 6.0 }
 0x196   : > { %v1697_v59 = vadd.f32 %v3312_v3, %v1658_v58 }
 0x197   : > { %2455 = vmatprep.mubr.msk.f32.mxu1 %vm709_vm2, %v1760_v25  ;;  %v2483_v25 = vld [vmem:[%s2569_s8 + $0x78] sm:$0xff] }
 0x198   : > { %v1729_v35 = vmax.f32 %v1697_v59, 0.0 }
 0x19a   : > { %v1761_v12 = vmin.f32 %v1729_v35, 6.0 }
 0x19c   : > { %2456 = vmatmul.mubr.msk.f32.gmra.mxu1 %vm709_vm2, %v1761_v12  ;;  %v2484_v12 = vld [vmem:[%s2569_s8 + $0x70] sm:$0xff] }
 0x1b6   : > { %v2412_v33 = vpop.f32.mrf.mxu1 }
 0x1b7   : > { %v1938_v62 = vadd.f32 %v2412_v33, %v3526_v0 }
 0x1b8   : > { %v1932_v3 = vpop.f32.mrf.mxu1 }
 0x1b9   : > { %v2092_v22 = vadd.f32 %v2469_v50, %v1938_v62  ;;  %v1933_v51 = vadd.f32 %v3526_v0, %v1932_v3 }
 0x1bb   : > { %2124 = vst.msk [vmem:[%s3534_s30 + $0x8] sm:$0xff] %vm319_vm1, %v2092_v22  ;;  %v2091_v49 = vadd.f32 %v2470_v43, %v1933_v51  ;;  %v2485_v22 = vld [vmem:[%s2569_s8 + $0x88] sm:$0xff] }
 0x1bd   : > { %2123 = vst.msk [vmem:[%s3534_s30] sm:$0xff] %vm319_vm1, %v2091_v49  ;;  %v2486_v49 = vld [vmem:[%s2569_s8 + $0x80] sm:$0xff] }
 0x1c7   : > { %v2415_v48 = vpop.f32.mrf.mxu1 }
 0x1c8   : > { %v1948_v11 = vadd.f32 %v2415_v48, %v3526_v0 }
 0x1c9   : > { %v1942_v15 = vpop.f32.mrf.mxu1 }
 0x1ca   : > { %v2094_v47 = vadd.f32 %v2471_v61, %v1948_v11  ;;  %v1943_v1 = vadd.f32 %v3526_v0, %v1942_v15 }
 0x1cc   : > { %2126 = vst.msk [vmem:[%s3534_s30 + $0x18] sm:$0xff] %vm319_vm1, %v2094_v47  ;;  %v2093_v16 = vadd.f32 %v2472_v40, %v1943_v1  ;;  %v2487_v47 = vld [vmem:[%s2569_s8 + $0x98] sm:$0xff] }
 0x1ce   : > { %2125 = vst.msk [vmem:[%s3534_s30 + $0x10] sm:$0xff] %vm319_vm1, %v2093_v16  ;;  %v2488_v16 = vld [vmem:[%s2569_s8 + $0x90] sm:$0xff] }
 0x1d6   : > { %v2418_v19 = vpop.f32.mrf.mxu1 }
 0x1d7   : > { %v1958_v18 = vadd.f32 %v2418_v19, %v3526_v0 }
 0x1d8   : > { %v1952_v30 = vpop.f32.mrf.mxu1 }
 0x1d9   : > { %v2096_v37 = vadd.f32 %v2473_v56, %v1958_v18  ;;  %v1953_v2 = vadd.f32 %v3526_v0, %v1952_v30 }
 0x1db   : > { %2128 = vst.msk [vmem:[%s3534_s30 + $0x28] sm:$0xff] %vm319_vm1, %v2096_v37  ;;  %v2095_v23 = vadd.f32 %v2474_v44, %v1953_v2  ;;  %v2489_v37 = vld [vmem:[%s2569_s8 + $0xa8] sm:$0xff] }
 0x1dd   : > { %2127 = vst.msk [vmem:[%s3534_s30 + $0x20] sm:$0xff] %vm319_vm1, %v2095_v23  ;;  %v2490_v23 = vld [vmem:[%s2569_s8 + $0xa0] sm:$0xff] }
 0x1e1   : > { %v2421_v38 = vpop.f32.mrf.mxu1 }
 0x1e2   : > { %v1968_v63 = vadd.f32 %v2421_v38, %v3526_v0 }
 0x1e3   : > { %v1962_v45 = vpop.f32.mrf.mxu1 }
 0x1e4   : > { %v2098_v24 = vadd.f32 %v2475_v28, %v1968_v63  ;;  %v1963_v32 = vadd.f32 %v3526_v0, %v1962_v45 }
 0x1e6   : > { %2130 = vst.msk [vmem:[%s3534_s30 + $0x38] sm:$0xff] %vm319_vm1, %v2098_v24  ;;  %v2097_v52 = vadd.f32 %v2476_v60, %v1963_v32  ;;  %v2491_v24 = vld [vmem:[%s2569_s8 + $0xb8] sm:$0xff] }
 0x1e8   : > { %2129 = vst.msk [vmem:[%s3534_s30 + $0x30] sm:$0xff] %vm319_vm1, %v2097_v52  ;;  %v2492_v52 = vld [vmem:[%s2569_s8 + $0xb0] sm:$0xff] }
 0x1ec   : > { %v2424_v10 = vpop.f32.mrf.mxu1 }
 0x1ed   : > { %v1978_v31 = vadd.f32 %v2424_v10, %v3526_v0 }
 0x1ee   : > { %v1972_v7 = vpop.f32.mrf.mxu1 }
 0x1ef   : > { %v2100_v9 = vadd.f32 %v2477_v27, %v1978_v31  ;;  %v1973_v42 = vadd.f32 %v3526_v0, %v1972_v7 }
 0x1f1   : > { %2132 = vst.msk [vmem:[%s3534_s30 + $0x48] sm:$0xff] %vm319_vm1, %v2100_v9  ;;  %v2099_v53 = vadd.f32 %v2478_v36, %v1973_v42  ;;  %v2493_v9 = vld [vmem:[%s2569_s8 + $0xc8] sm:$0xff] }
 0x1f3   : > { %2131 = vst.msk [vmem:[%s3534_s30 + $0x40] sm:$0xff] %vm319_vm1, %v2099_v53  ;;  %v2494_v53 = vld [vmem:[%s2569_s8 + $0xc0] sm:$0xff] }
 0x1f8   : > { %v2427_v39 = vpop.f32.mrf.mxu1 }
 0x1f9   : > { %v1988_v46 = vadd.f32 %v2427_v39, %v3526_v0 }
 0x1fa   : > { %v1982_v54 = vpop.f32.mrf.mxu1 }
 0x1fb   : > { %v2102_v6 = vadd.f32 %v2479_v13, %v1988_v46  ;;  %v1983_v17 = vadd.f32 %v3526_v0, %v1982_v54 }
 0x1fd   : > { %2134 = vst.msk [vmem:[%s3534_s30 + $0x58] sm:$0xff] %vm319_vm1, %v2102_v6  ;;  %v2101_v21 = vadd.f32 %v2480_v5, %v1983_v17  ;;  %v2495_v6 = vld [vmem:[%s2569_s8 + $0xd8] sm:$0xff] }
 0x1ff   : > { %2133 = vst.msk [vmem:[%s3534_s30 + $0x50] sm:$0xff] %vm319_vm1, %v2101_v21  ;;  %v2496_v21 = vld [vmem:[%s2569_s8 + $0xd0] sm:$0xff] }
 0x203   : > { %v2430_v55 = vpop.f32.mrf.mxu1 }
 0x204   : > { %v1998_v8 = vadd.f32 %v2430_v55, %v3526_v0 }
 0x205   : > { %v1992_v14 = vpop.f32.mrf.mxu1 }
 0x206   : > { %v2104_v4 = vadd.f32 %v2481_v34, %v1998_v8  ;;  %v1993_v26 = vadd.f32 %v3526_v0, %v1992_v14 }
 0x208   : > { %2136 = vst.msk [vmem:[%s3534_s30 + $0x68] sm:$0xff] %vm319_vm1, %v2104_v4  ;;  %v2103_v57 = vadd.f32 %v2482_v29, %v1993_v26  ;;  %v2497_v4 = vld [vmem:[%s2569_s8 + $0xe8] sm:$0xff] }
 0x20a   : > { %2135 = vst.msk [vmem:[%s3534_s30 + $0x60] sm:$0xff] %vm319_vm1, %v2103_v57  ;;  %v2498_v57 = vld [vmem:[%s2569_s8 + $0xe0] sm:$0xff] }
 0x20c   : > { %v2433_v20 = vpop.f32.mrf.mxu1 }
 0x20d   : > { %v2008_v41 = vadd.f32 %v2433_v20, %v3526_v0 }
 0x20e   : > { %v2002_v58 = vpop.f32.mrf.mxu1 }
 0x20f   : > { %v2106_v59 = vadd.f32 %v2483_v25, %v2008_v41  ;;  %v2003_v35 = vadd.f32 %v3526_v0, %v2002_v58 }
 0x211   : > { %2138 = vst.msk [vmem:[%s3534_s30 + $0x78] sm:$0xff] %vm319_vm1, %v2106_v59  ;;  %v2105_v33 = vadd.f32 %v2484_v12, %v2003_v35  ;;  %v2499_v59 = vld [vmem:[%s2569_s8 + $0xf8] sm:$0xff] }
 0x213   : > { %2137 = vst.msk [vmem:[%s3534_s30 + $0x70] sm:$0xff] %vm319_vm1, %v2105_v33  ;;  %v2500_v33 = vld [vmem:[%s2569_s8 + $0xf0] sm:$0xff] }
 0x216   : > { %v2436_v62 = vpop.f32.mrf.mxu1 }
 0x217   : > { %v2018_v3 = vadd.f32 %v2436_v62, %v3526_v0 }
 0x218   : > { %v2012_v50 = vpop.f32.mrf.mxu1 }
 0x219   : > { %v2108_v51 = vadd.f32 %v2485_v22, %v2018_v3  ;;  %v2013_v43 = vadd.f32 %v3526_v0, %v2012_v50 }
 0x21b   : > { %2140 = vst.msk [vmem:[%s3534_s30 + $0x88] sm:$0xff] %vm319_vm1, %v2108_v51  ;;  %v2107_v48 = vadd.f32 %v2486_v49, %v2013_v43 }
 0x21d   : > { %2139 = vst.msk [vmem:[%s3534_s30 + $0x80] sm:$0xff] %vm319_vm1, %v2107_v48 }
 0x221   : > { %v2439_v11 = vpop.f32.mrf.mxu1 }
 0x222   : > { %v2028_v15 = vadd.f32 %v2439_v11, %v3526_v0 }
 0x223   : > { %v2022_v61 = vpop.f32.mrf.mxu1 }
 0x224   : > { %v2110_v1 = vadd.f32 %v2487_v47, %v2028_v15  ;;  %v2023_v40 = vadd.f32 %v3526_v0, %v2022_v61 }
 0x226   : > { %2142 = vst.msk [vmem:[%s3534_s30 + $0x98] sm:$0xff] %vm319_vm1, %v2110_v1  ;;  %v2109_v19 = vadd.f32 %v2488_v16, %v2023_v40 }
 0x228   : > { %2141 = vst.msk [vmem:[%s3534_s30 + $0x90] sm:$0xff] %vm319_vm1, %v2109_v19 }
 0x22a   : > { %v2442_v18 = vpop.f32.mrf.mxu1 }
 0x22b   : > { %v2038_v30 = vadd.f32 %v2442_v18, %v3526_v0 }
 0x22c   : > { %v2032_v56 = vpop.f32.mrf.mxu1 }
 0x22d   : > { %v2112_v2 = vadd.f32 %v2489_v37, %v2038_v30  ;;  %v2033_v44 = vadd.f32 %v3526_v0, %v2032_v56 }
 0x22f   : > { %2144 = vst.msk [vmem:[%s3534_s30 + $0xa8] sm:$0xff] %vm319_vm1, %v2112_v2  ;;  %v2111_v38 = vadd.f32 %v2490_v23, %v2033_v44 }
 0x231   : > { %2143 = vst.msk [vmem:[%s3534_s30 + $0xa0] sm:$0xff] %vm319_vm1, %v2111_v38 }
 0x235   : > { %v2445_v63 = vpop.f32.mrf.mxu1 }
 0x236   : > { %v2048_v45 = vadd.f32 %v2445_v63, %v3526_v0 }
 0x237   : > { %v2042_v28 = vpop.f32.mrf.mxu1 }
 0x238   : > { %v2114_v32 = vadd.f32 %v2491_v24, %v2048_v45  ;;  %v2043_v60 = vadd.f32 %v3526_v0, %v2042_v28 }
 0x23a   : > { %2146 = vst.msk [vmem:[%s3534_s30 + $0xb8] sm:$0xff] %vm319_vm1, %v2114_v32  ;;  %v2113_v10 = vadd.f32 %v2492_v52, %v2043_v60 }
 0x23c   : > { %2145 = vst.msk [vmem:[%s3534_s30 + $0xb0] sm:$0xff] %vm319_vm1, %v2113_v10 }
 0x23e   : > { %v2448_v31 = vpop.f32.mrf.mxu1 }
 0x23f   : > { %v2058_v7 = vadd.f32 %v2448_v31, %v3526_v0 }
 0x240   : > { %v2052_v27 = vpop.f32.mrf.mxu1 }
 0x241   : > { %v2116_v42 = vadd.f32 %v2493_v9, %v2058_v7  ;;  %v2053_v36 = vadd.f32 %v3526_v0, %v2052_v27 }
 0x243   : > { %2148 = vst.msk [vmem:[%s3534_s30 + $0xc8] sm:$0xff] %vm319_vm1, %v2116_v42  ;;  %v2115_v39 = vadd.f32 %v2494_v53, %v2053_v36 }
 0x245   : > { %2147 = vst.msk [vmem:[%s3534_s30 + $0xc0] sm:$0xff] %vm319_vm1, %v2115_v39 }
 0x249   : > { %v2451_v46 = vpop.f32.mrf.mxu1 }
 0x24a   : > { %v2068_v54 = vadd.f32 %v2451_v46, %v3526_v0 }
 0x24b   : > { %v2062_v13 = vpop.f32.mrf.mxu1 }
 0x24c   : > { %v2118_v17 = vadd.f32 %v2495_v6, %v2068_v54  ;;  %v2063_v5 = vadd.f32 %v3526_v0, %v2062_v13 }
 0x24e   : > { %2150 = vst.msk [vmem:[%s3534_s30 + $0xd8] sm:$0xff] %vm319_vm1, %v2118_v17  ;;  %v2117_v55 = vadd.f32 %v2496_v21, %v2063_v5 }
 0x250   : > { %2149 = vst.msk [vmem:[%s3534_s30 + $0xd0] sm:$0xff] %vm319_vm1, %v2117_v55 }
 0x252   : > { %v2454_v8 = vpop.f32.mrf.mxu1 }
 0x253   : > { %v2078_v14 = vadd.f32 %v2454_v8, %v3526_v0 }
 0x254   : > { %v2072_v34 = vpop.f32.mrf.mxu1 }
 0x255   : > { %v2120_v26 = vadd.f32 %v2497_v4, %v2078_v14  ;;  %v2073_v29 = vadd.f32 %v3526_v0, %v2072_v34 }
 0x257   : > { %2152 = vst.msk [vmem:[%s3534_s30 + $0xe8] sm:$0xff] %vm319_vm1, %v2120_v26  ;;  %v2119_v20 = vadd.f32 %v2498_v57, %v2073_v29 }
 0x259   : > { %2151 = vst.msk [vmem:[%s3534_s30 + $0xe0] sm:$0xff] %vm319_vm1, %v2119_v20 }
 0x25c   : > { %v2457_v41 = vpop.f32.mrf.mxu1 }
 0x25d   : > { %v2088_v58 = vadd.f32 %v2457_v41, %v3526_v0 }
 0x25e   : > { %v2082_v25 = vpop.f32.mrf.mxu1 }
 0x25f   : > { %v2122_v35 = vadd.f32 %v2499_v59, %v2088_v58  ;;  %v2083_v12 = vadd.f32 %v3526_v0, %v2082_v25 }
 0x261   : > { %2154 = vst.msk [vmem:[%s3534_s30 + $0xf8] sm:$0xff] %vm319_vm1, %v2122_v35  ;;  %v2121_v62 = vadd.f32 %v2500_v33, %v2083_v12 }
 0x263   : > { %2153 = vst.msk [vmem:[%s3534_s30 + $0xf0] sm:$0xff] %vm319_vm1, %v2121_v62 }
 0x264 PF: > { %s17_s24 = sadd.s32 1, %s2507_s24  }
 0x265   : > { %p14_p4 = scmp.ge.s32.totalorder %s17_s24, 4  }
 0x267   :  { %16 = sbr.rel (!%p14_p4) target bundleno = 1 (0x1), region = 81 }

</bundles_post_ra>
